<compile_context>
chip_gen: v6e
topology: v6e:2x2x1
jax: 0.10.0
libtpu: 0.0.40
codegen_flags: <defaults>
</compile_context>

<pallas_src>
import functools
import math

import jax
import jax.numpy as jnp
import numpy as np
from jax.experimental import pallas as pl
from jax.experimental.pallas import tpu as pltpu


# ----------------------------------------------------------------------------
# Fused kernel
# ----------------------------------------------------------------------------

def _fused_invres_kernel(x_ref, we_ref, be_ref, wd_ref, bd_ref, wp_ref, bp_ref,
                         o_ref, hid_ref, *, row_tile, expand, identity):
    # x_ref : (H, W, Cp)        f32   full image (batch dim squeezed), resident
    # we_ref: (Cp, Hd)          bf16  expand weight, BN scale folded
    # be_ref: (1, Hd)           f32
    # wd_ref: (3, 3, Hd)        f32   depthwise weight, BN scale folded
    # bd_ref: (1, Hd)           f32
    # wp_ref: (Hd, Cop)         bf16  project weight, BN scale folded
    # bp_ref: (1, Cop)          f32
    # o_ref : (row_tile, W, Cop) f32  output row band
    # hid_ref: scratch (row_tile+2, W+2, Hd) f32  hidden activation + halo
    H, W, _ = x_ref.shape
    Hd = hid_ref.shape[2]
    Cop = o_ref.shape[-1]
    th = row_tile

    ht = pl.program_id(1)
    nh = pl.num_programs(1)
    base = pl.multiple_of(ht * th, th)          # first output row of this band

    def expanded(rows):
        # rows: (r, W, Cp) f32 -> 1x1 expand conv (bf16 MXU, f32 acc) + bias + ReLU6
        if not expand:
            return rows                         # expand_ratio == 1: hidden == input
        r = rows.shape[0]
        y = jnp.dot(rows.reshape(r * W, rows.shape[-1]).astype(jnp.bfloat16),
                    we_ref[...], preferred_element_type=jnp.float32)
        y = jnp.clip(y + be_ref[...], 0.0, 6.0)
        return y.reshape(r, W, Hd)

    # Zero the scratch: establishes the zero-padding border columns and the
    # (masked) halo rows at the top/bottom of the image.
    hid_ref[...] = jnp.zeros_like(hid_ref)

    # Body rows of this band -> scratch rows [1, th+1).
    hid_ref[1:th + 1, 1:W + 1, :] = expanded(x_ref[pl.ds(base, th), :, :])

    # Halo rows: recompute the expand conv for one row above / below the band,
    # zeroed when the band touches the image border (conv "same" padding).
    top = expanded(x_ref[pl.ds(jnp.maximum(base - 1, 0), 1), :, :])
    hid_ref[0:1, 1:W + 1, :] = top * (ht > 0).astype(jnp.float32)
    bot = expanded(x_ref[pl.ds(jnp.minimum(base + th, H - 1), 1), :, :])
    hid_ref[th + 1:th + 2, 1:W + 1, :] = bot * (ht < nh - 1).astype(jnp.float32)

    # Depthwise 3x3, stride 1, pad 1 (+ folded-BN bias + ReLU6), f32 on the VPU.
    acc = jnp.zeros((th, W, Hd), jnp.float32)
    for dh in range(3):
        for dw in range(3):
            acc = acc + hid_ref[dh:dh + th, dw:dw + W, :] * wd_ref[dh, dw, :]
    acc = jnp.clip(acc + bd_ref[0], 0.0, 6.0)

    # Project 1x1 (bf16 MXU, f32 acc) + bias, fused residual add.
    y = jnp.dot(acc.reshape(th * W, Hd).astype(jnp.bfloat16), wp_ref[...],
                preferred_element_type=jnp.float32)
    y = (y + bp_ref[...]).reshape(th, W, Cop)
    if identity:
        y = y + x_ref[pl.ds(base, th), :, :]    # x block already resident in VMEM
    o_ref[...] = y


# ----------------------------------------------------------------------------
# Helpers
# ----------------------------------------------------------------------------

def _round_up(x, m):
    return ((x + m - 1) // m) * m


def _pick_row_tile(H, max_rows=8):
    # Largest divisor of H not exceeding max_rows (keeps the scratch small and
    # gives the grid several steps to pipeline / shard across cores).
    for t in range(min(H, max_rows), 0, -1):
        if H % t == 0:
            return t
    return H


def _pad_to(a, shape):
    out = jnp.zeros(shape, a.dtype)
    return out.at[tuple(slice(0, s) for s in a.shape)].set(a)


# ----------------------------------------------------------------------------
# InvertedResidual module (JAX / Pallas)
# ----------------------------------------------------------------------------

class InvertedResidualPallas:
    LANE = 128   # channel padding multiple (lane-dense stores / MXU K,N tiles)

    def __init__(self, C_in, C_out, stride, expand_ratio, key):
        assert stride in (1, 2)
        assert stride == 1, "TODO(synk): stride=2 path not implemented"
        hidden = int(round(C_in * expand_ratio))
        self.C_in, self.C_out, self.hidden = C_in, C_out, hidden
        self.stride = stride
        self.expand = expand_ratio != 1
        self.identity = (stride == 1 and C_in == C_out)

        self.Cp = _round_up(C_in, self.LANE)
        self.Hd = _round_up(hidden, self.LANE)
        self.Cop = _round_up(C_out, self.LANE)
        if self.identity:
            assert self.Cp == self.Cop

        keys = jax.random.split(key, 6)

        def conv_w(k, shape, fan_in):
            return jax.random.normal(k, shape, jnp.float32) / math.sqrt(fan_in)

        def bn(k, c, eps=1e-5):
            k1, k2, k3 = jax.random.split(k, 3)
            gamma = 1.0 + 0.1 * jax.random.normal(k1, (c,), jnp.float32)
            beta = 0.1 * jax.random.normal(k2, (c,), jnp.float32)
            mean = 0.05 * jax.random.normal(k3, (c,), jnp.float32)
            var = 0.9 * jnp.ones((c,), jnp.float32)
            scale = gamma / jnp.sqrt(var + eps)
            bias = beta - mean * scale
            return scale, bias

        # expand 1x1 (matmul layout (C_in, hidden)), BN scale folded into weight
        if self.expand:
            we = conv_w(keys[0], (C_in, hidden), C_in)
            s, b = bn(keys[1], hidden)
            self.we_f, self.be_f = we * s[None, :], b
            self.we_bf = self.we_f.astype(jnp.bfloat16)
            self.we = _pad_to(self.we_bf, (self.Cp, self.Hd))
            self.be = _pad_to(self.be_f[None, :], (1, self.Hd))
        else:
            self.we = jnp.zeros((self.Cp, self.Hd), jnp.bfloat16)   # unused
            self.be = jnp.zeros((1, self.Hd), jnp.float32)          # unused

        # depthwise 3x3 (HWC layout), BN scale folded; kept f32 (VPU path)
        wd = conv_w(keys[2], (3, 3, hidden), 9)
        s, b = bn(keys[3], hidden)
        self.wd_f, self.bd_f = wd * s[None, None, :], b
        self.wd = _pad_to(self.wd_f, (3, 3, self.Hd))
        self.bd = _pad_to(self.bd_f[None, :], (1, self.Hd))

        # project 1x1 (matmul layout (hidden, C_out)), BN scale folded
        wp = conv_w(keys[4], (hidden, C_out), hidden)
        s, b = bn(keys[5], C_out)
        self.wp_f, self.bp_f = wp * s[None, :], b
        self.wp_bf = self.wp_f.astype(jnp.bfloat16)
        self.wp = _pad_to(self.wp_bf, (self.Hd, self.Cop))
        self.bp = _pad_to(self.bp_f[None, :], (1, self.Cop))

    def __call__(self, x_nchw):
        N, C, H, W = x_nchw.shape
        assert C == self.C_in
        # NCHW -> NHWC so the channel axis rides the 128-lane vreg dimension.
        x = jnp.transpose(x_nchw, (0, 2, 3, 1)).astype(jnp.float32)
        if self.Cp != C:
            x = jnp.pad(x, ((0, 0), (0, 0), (0, 0), (0, self.Cp - C)))

        th = _pick_row_tile(H)
        kernel = functools.partial(_fused_invres_kernel, row_tile=th,
                                   expand=self.expand, identity=self.identity)

        y = pl.pallas_call(
            kernel,
            out_shape=jax.ShapeDtypeStruct((N, H, W, self.Cop), jnp.float32),
            grid=(N, H // th),
            in_specs=[
                # Full image per batch element, index-invariant along the row
                # axis -> stays resident in VMEM across the h-tile loop.
                pl.BlockSpec((None, H, W, self.Cp), lambda n, h: (n, 0, 0, 0)),
                pl.BlockSpec((self.Cp, self.Hd), lambda n, h: (0, 0)),
                pl.BlockSpec((1, self.Hd), lambda n, h: (0, 0)),
                pl.BlockSpec((3, 3, self.Hd), lambda n, h: (0, 0, 0)),
                pl.BlockSpec((1, self.Hd), lambda n, h: (0, 0)),
                pl.BlockSpec((self.Hd, self.Cop), lambda n, h: (0, 0)),
                pl.BlockSpec((1, self.Cop), lambda n, h: (0, 0)),
            ],
            out_specs=pl.BlockSpec((None, th, W, self.Cop),
                                   lambda n, h: (n, h, 0, 0)),
            scratch_shapes=[pltpu.VMEM((th + 2, W + 2, self.Hd), jnp.float32)],
            compiler_params=pltpu.CompilerParams(
                dimension_semantics=("parallel", "arbitrary"),
                vmem_limit_bytes=32 * 1024 * 1024),
        )(x, self.we, self.be, self.wd, self.bd, self.wp, self.bp)

        y = y[..., :self.C_out]
        return jnp.transpose(y, (0, 3, 1, 2))    # back to NCHW

    # Pure-JAX reference of the same math (bf16 at matmul inputs, f32 elsewhere).
    def reference(self, x_nchw):
        x = jnp.transpose(x_nchw, (0, 2, 3, 1)).astype(jnp.float32)
        N, H, W, C = x.shape
        h = x
        if self.expand:
            h = jnp.einsum('nhwc,cd->nhwd', h.astype(jnp.bfloat16), self.we_bf,
                           preferred_element_type=jnp.float32)
            h = jnp.clip(h + self.be_f, 0.0, 6.0)
        hp = jnp.pad(h, ((0, 0), (1, 1), (1, 1), (0, 0)))
        acc = jnp.zeros_like(h)
        for dh in range(3):
            for dw in range(3):
                acc = acc + hp[:, dh:dh + H, dw:dw + W, :] * self.wd_f[dh, dw]
        h = jnp.clip(acc + self.bd_f, 0.0, 6.0)
        y = jnp.einsum('nhwc,cd->nhwd', h.astype(jnp.bfloat16), self.wp_bf,
                       preferred_element_type=jnp.float32) + self.bp_f
        if self.identity:
            y = y + x
        return jnp.transpose(y, (0, 3, 1, 2))


# ----------------------------------------------------------------------------

if __name__ == "__main__":
    key = jax.random.PRNGKey(0)
    k_param, k_x = jax.random.split(key)

    N, C_in, H, W = 2, 8, 16, 16
    C_out, stride, expand_ratio = 8, 1, 4   # identity residual branch active

    block = InvertedResidualPallas(C_in, C_out, stride, expand_ratio, k_param)
    x = jax.random.normal(k_x, (N, C_in, H, W), jnp.float32)

    out = jax.block_until_ready(block(x))
    ref = jax.block_until_ready(block.reference(x))

    np.testing.assert_allclose(np.asarray(out), np.asarray(ref),
                               rtol=1e-2, atol=1e-2)
    assert out.shape == (N, C_out, H, W)
    print("KERNEL_OK")
</pallas_src>

<mosaic_0001>
module attributes {stable_mosaic.version = 11 : i64} {
  func.func @_fused_invres_kernel(%arg0: i32, %arg1: i32, %arg2: memref<1x16x16x128xf32, #tpu.memory_space<vmem>>, %arg3: memref<128x128xbf16, #tpu.memory_space<vmem>>, %arg4: memref<1x128xf32, #tpu.memory_space<vmem>>, %arg5: memref<3x3x128xf32, #tpu.memory_space<vmem>>, %arg6: memref<1x128xf32, #tpu.memory_space<vmem>>, %arg7: memref<128x128xbf16, #tpu.memory_space<vmem>>, %arg8: memref<1x128xf32, #tpu.memory_space<vmem>>, %arg9: memref<1x8x16x128xf32, #tpu.memory_space<vmem>>, %arg10: memref<10x18x128xf32, #tpu.memory_space<vmem>>) attributes {dimension_semantics = [#tpu.dimension_semantics<parallel>, #tpu.dimension_semantics<arbitrary>], iteration_bounds = array<i64: 2, 2>, scalar_prefetch = 0 : i64, scratch_operands = 1 : i64, tpu.core_type = #tpu.core_type<tc>, window_params = [{transform_indices = @transform_0, window_bounds = array<i64: 1, 16, 16, 128>}, {pipeline_mode = #tpu.pipeline_mode<synchronous>, transform_indices = @transform_1, window_bounds = array<i64: 128, 128>}, {pipeline_mode = #tpu.pipeline_mode<synchronous>, transform_indices = @transform_2, window_bounds = array<i64: 1, 128>}, {pipeline_mode = #tpu.pipeline_mode<synchronous>, transform_indices = @transform_3, window_bounds = array<i64: 3, 3, 128>}, {pipeline_mode = #tpu.pipeline_mode<synchronous>, transform_indices = @transform_4, window_bounds = array<i64: 1, 128>}, {pipeline_mode = #tpu.pipeline_mode<synchronous>, transform_indices = @transform_5, window_bounds = array<i64: 128, 128>}, {pipeline_mode = #tpu.pipeline_mode<synchronous>, transform_indices = @transform_6, window_bounds = array<i64: 1, 128>}, {transform_indices = @transform_7, window_bounds = array<i64: 1, 8, 16, 128>}]} {
    %c8_i32 = arith.constant 8 : i32
    %0 = arith.muli %arg1, %c8_i32 : i32
    %1 = tpu.assume_multiple %0, 8 : i32
    %cst = arith.constant 0.000000e+00 : f32
    %2 = vector.broadcast %cst : f32 to vector<10x18x128xf32>
    %c0 = arith.constant 0 : index
    %c0_0 = arith.constant 0 : index
    %c0_1 = arith.constant 0 : index
    %3 = vector.load %arg10[%c0, %c0_0, %c0_1] : memref<10x18x128xf32, #tpu.memory_space<vmem>>, vector<10x18x128xf32>
    tpu.vector_store %arg10[%c0, %c0_0, %c0_1], %2 {strides = array<i32>} : memref<10x18x128xf32, #tpu.memory_space<vmem>>, vector<10x18x128xf32>,
    %c0_2 = arith.constant 0 : index
    %4 = arith.index_cast %1 : i32 to index
    %c0_3 = arith.constant 0 : index
    %c0_4 = arith.constant 0 : index
    %5 = vector.load %arg2[%c0_2, %4, %c0_3, %c0_4] : memref<1x16x16x128xf32, #tpu.memory_space<vmem>>, vector<1x8x16x128xf32>
    %6 = vector.shape_cast %5 : vector<1x8x16x128xf32> to vector<8x16x128xf32>
    %7 = vector.shape_cast %6 : vector<8x16x128xf32> to vector<128x128xf32>
    %8 = arith.truncf %7 : vector<128x128xf32> to vector<128x128xbf16>
    %c0_5 = arith.constant 0 : index
    %c0_6 = arith.constant 0 : index
    %9 = vector.load %arg3[%c0_5, %c0_6] : memref<128x128xbf16, #tpu.memory_space<vmem>>, vector<128x128xbf16>
    %cst_7 = arith.constant dense<0.000000e+00> : vector<128x128xf32>
    %10 = tpu.matmul %8, %9, %cst_7 {dimension_numbers = #tpu.dot_dimension_numbers<[1], [0], [0], [1], [0, 0, 1, 1], [], []>} : vector<128x128xbf16>, vector<128x128xbf16>, vector<128x128xf32> -> vector<128x128xf32>
    %c0_8 = arith.constant 0 : index
    %c0_9 = arith.constant 0 : index
    %11 = vector.load %arg4[%c0_8, %c0_9] : memref<1x128xf32, #tpu.memory_space<vmem>>, vector<1x128xf32>
    %12 = vector.broadcast %11 : vector<1x128xf32> to vector<128x128xf32>
    %13 = arith.addf %10, %12 : vector<128x128xf32>
    %cst_10 = arith.constant 0.000000e+00 : f32
    %cst_11 = arith.constant 6.000000e+00 : f32
    %14 = vector.broadcast %cst_10 : f32 to vector<128x128xf32>
    %15 = arith.maximumf %14, %13 : vector<128x128xf32>
    %16 = vector.broadcast %cst_11 : f32 to vector<128x128xf32>
    %17 = arith.minimumf %16, %15 : vector<128x128xf32>
    %18 = vector.shape_cast %17 : vector<128x128xf32> to vector<8x16x128xf32>
    %c1 = arith.constant 1 : index
    %c1_12 = arith.constant 1 : index
    %c0_13 = arith.constant 0 : index
    %19 = vector.load %arg10[%c1, %c1_12, %c0_13] : memref<10x18x128xf32, #tpu.memory_space<vmem>>, vector<8x16x128xf32>
    tpu.vector_store %arg10[%c1, %c1_12, %c0_13], %18 {strides = array<i32>} : memref<10x18x128xf32, #tpu.memory_space<vmem>>, vector<8x16x128xf32>,
    %c1_i32 = arith.constant 1 : i32
    %20 = arith.subi %1, %c1_i32 : i32
    %c0_i32 = arith.constant 0 : i32
    %21 = arith.maxsi %20, %c0_i32 : i32
    %c0_14 = arith.constant 0 : index
    %22 = arith.index_cast %21 : i32 to index
    %c0_15 = arith.constant 0 : index
    %c0_16 = arith.constant 0 : index
    %23 = vector.load %arg2[%c0_14, %22, %c0_15, %c0_16] : memref<1x16x16x128xf32, #tpu.memory_space<vmem>>, vector<1x1x16x128xf32>
    %24 = vector.shape_cast %23 : vector<1x1x16x128xf32> to vector<1x16x128xf32>
    %25 = vector.shape_cast %24 : vector<1x16x128xf32> to vector<16x128xf32>
    %26 = arith.truncf %25 : vector<16x128xf32> to vector<16x128xbf16>
    %c0_17 = arith.constant 0 : index
    %c0_18 = arith.constant 0 : index
    %27 = vector.load %arg3[%c0_17, %c0_18] : memref<128x128xbf16, #tpu.memory_space<vmem>>, vector<128x128xbf16>
    %cst_19 = arith.constant dense<0.000000e+00> : vector<16x128xf32>
    %28 = tpu.matmul %26, %27, %cst_19 {dimension_numbers = #tpu.dot_dimension_numbers<[1], [0], [0], [1], [0, 0, 1, 1], [], []>} : vector<16x128xbf16>, vector<128x128xbf16>, vector<16x128xf32> -> vector<16x128xf32>
    %c0_20 = arith.constant 0 : index
    %c0_21 = arith.constant 0 : index
    %29 = vector.load %arg4[%c0_20, %c0_21] : memref<1x128xf32, #tpu.memory_space<vmem>>, vector<1x128xf32>
    %30 = vector.broadcast %29 : vector<1x128xf32> to vector<16x128xf32>
    %31 = arith.addf %28, %30 : vector<16x128xf32>
    %cst_22 = arith.constant 0.000000e+00 : f32
    %cst_23 = arith.constant 6.000000e+00 : f32
    %32 = vector.broadcast %cst_22 : f32 to vector<16x128xf32>
    %33 = arith.maximumf %32, %31 : vector<16x128xf32>
    %34 = vector.broadcast %cst_23 : f32 to vector<16x128xf32>
    %35 = arith.minimumf %34, %33 : vector<16x128xf32>
    %36 = vector.shape_cast %35 : vector<16x128xf32> to vector<1x16x128xf32>
    %c0_i32_24 = arith.constant 0 : i32
    %37 = arith.cmpi sgt, %arg1, %c0_i32_24 : i32
    %38 = arith.extui %37 : i1 to i32
    %39 = arith.sitofp %38 : i32 to f32
    %40 = vector.broadcast %39 : f32 to vector<1x16x128xf32>
    %41 = arith.mulf %36, %40 : vector<1x16x128xf32>
    %c0_25 = arith.constant 0 : index
    %c1_26 = arith.constant 1 : index
    %c0_27 = arith.constant 0 : index
    %42 = vector.load %arg10[%c0_25, %c1_26, %c0_27] : memref<10x18x128xf32, #tpu.memory_space<vmem>>, vector<1x16x128xf32>
    tpu.vector_store %arg10[%c0_25, %c1_26, %c0_27], %41 {strides = array<i32>} : memref<10x18x128xf32, #tpu.memory_space<vmem>>, vector<1x16x128xf32>,
    %c8_i32_28 = arith.constant 8 : i32
    %43 = arith.addi %1, %c8_i32_28 : i32
    %c15_i32 = arith.constant 15 : i32
    %44 = arith.minsi %43, %c15_i32 : i32
    %c0_29 = arith.constant 0 : index
    %45 = arith.index_cast %44 : i32 to index
    %c0_30 = arith.constant 0 : index
    %c0_31 = arith.constant 0 : index
    %46 = vector.load %arg2[%c0_29, %45, %c0_30, %c0_31] : memref<1x16x16x128xf32, #tpu.memory_space<vmem>>, vector<1x1x16x128xf32>
    %47 = vector.shape_cast %46 : vector<1x1x16x128xf32> to vector<1x16x128xf32>
    %48 = vector.shape_cast %47 : vector<1x16x128xf32> to vector<16x128xf32>
    %49 = arith.truncf %48 : vector<16x128xf32> to vector<16x128xbf16>
    %c0_32 = arith.constant 0 : index
    %c0_33 = arith.constant 0 : index
    %50 = vector.load %arg3[%c0_32, %c0_33] : memref<128x128xbf16, #tpu.memory_space<vmem>>, vector<128x128xbf16>
    %cst_34 = arith.constant dense<0.000000e+00> : vector<16x128xf32>
    %51 = tpu.matmul %49, %50, %cst_34 {dimension_numbers = #tpu.dot_dimension_numbers<[1], [0], [0], [1], [0, 0, 1, 1], [], []>} : vector<16x128xbf16>, vector<128x128xbf16>, vector<16x128xf32> -> vector<16x128xf32>
    %c0_35 = arith.constant 0 : index
    %c0_36 = arith.constant 0 : index
    %52 = vector.load %arg4[%c0_35, %c0_36] : memref<1x128xf32, #tpu.memory_space<vmem>>, vector<1x128xf32>
    %53 = vector.broadcast %52 : vector<1x128xf32> to vector<16x128xf32>
    %54 = arith.addf %51, %53 : vector<16x128xf32>
    %cst_37 = arith.constant 0.000000e+00 : f32
    %cst_38 = arith.constant 6.000000e+00 : f32
    %55 = vector.broadcast %cst_37 : f32 to vector<16x128xf32>
    %56 = arith.maximumf %55, %54 : vector<16x128xf32>
    %57 = vector.broadcast %cst_38 : f32 to vector<16x128xf32>
    %58 = arith.minimumf %57, %56 : vector<16x128xf32>
    %59 = vector.shape_cast %58 : vector<16x128xf32> to vector<1x16x128xf32>
    %c1_i32_39 = arith.constant 1 : i32
    %60 = arith.cmpi slt, %arg1, %c1_i32_39 : i32
    %61 = arith.extui %60 : i1 to i32
    %62 = arith.sitofp %61 : i32 to f32
    %63 = vector.broadcast %62 : f32 to vector<1x16x128xf32>
    %64 = arith.mulf %59, %63 : vector<1x16x128xf32>
    %c9 = arith.constant 9 : index
    %c1_40 = arith.constant 1 : index
    %c0_41 = arith.constant 0 : index
    %65 = vector.load %arg10[%c9, %c1_40, %c0_41] : memref<10x18x128xf32, #tpu.memory_space<vmem>>, vector<1x16x128xf32>
    tpu.vector_store %arg10[%c9, %c1_40, %c0_41], %64 {strides = array<i32>} : memref<10x18x128xf32, #tpu.memory_space<vmem>>, vector<1x16x128xf32>,
    %cst_42 = arith.constant 0.000000e+00 : f32
    %66 = vector.broadcast %cst_42 : f32 to vector<8x16x128xf32>
    %c0_43 = arith.constant 0 : index
    %c0_44 = arith.constant 0 : index
    %c0_45 = arith.constant 0 : index
    %67 = vector.load %arg10[%c0_43, %c0_44, %c0_45] : memref<10x18x128xf32, #tpu.memory_space<vmem>>, vector<8x16x128xf32>
    %c0_46 = arith.constant 0 : index
    %c0_47 = arith.constant 0 : index
    %c0_48 = arith.constant 0 : index
    %68 = vector.load %arg5[%c0_46, %c0_47, %c0_48] : memref<3x3x128xf32, #tpu.memory_space<vmem>>, vector<1x1x128xf32>
    %69 = vector.shape_cast %68 : vector<1x1x128xf32> to vector<128xf32>
    %70 = vector.shape_cast %69 : vector<128xf32> to vector<1x1x128xf32>
    %71 = vector.broadcast %70 : vector<1x1x128xf32> to vector<8x16x128xf32>
    %72 = arith.mulf %67, %71 : vector<8x16x128xf32>
    %73 = arith.addf %66, %72 : vector<8x16x128xf32>
    %c0_49 = arith.constant 0 : index
    %c1_50 = arith.constant 1 : index
    %c0_51 = arith.constant 0 : index
    %74 = vector.load %arg10[%c0_49, %c1_50, %c0_51] : memref<10x18x128xf32, #tpu.memory_space<vmem>>, vector<8x16x128xf32>
    %c0_52 = arith.constant 0 : index
    %c1_53 = arith.constant 1 : index
    %c0_54 = arith.constant 0 : index
    %75 = vector.load %arg5[%c0_52, %c1_53, %c0_54] : memref<3x3x128xf32, #tpu.memory_space<vmem>>, vector<1x1x128xf32>
    %76 = vector.shape_cast %75 : vector<1x1x128xf32> to vector<128xf32>
    %77 = vector.shape_cast %76 : vector<128xf32> to vector<1x1x128xf32>
    %78 = vector.broadcast %77 : vector<1x1x128xf32> to vector<8x16x128xf32>
    %79 = arith.mulf %74, %78 : vector<8x16x128xf32>
    %80 = arith.addf %73, %79 : vector<8x16x128xf32>
    %c0_55 = arith.constant 0 : index
    %c2 = arith.constant 2 : index
    %c0_56 = arith.constant 0 : index
    %81 = vector.load %arg10[%c0_55, %c2, %c0_56] : memref<10x18x128xf32, #tpu.memory_space<vmem>>, vector<8x16x128xf32>
    %c0_57 = arith.constant 0 : index
    %c2_58 = arith.constant 2 : index
    %c0_59 = arith.constant 0 : index
    %82 = vector.load %arg5[%c0_57, %c2_58, %c0_59] : memref<3x3x128xf32, #tpu.memory_space<vmem>>, vector<1x1x128xf32>
    %83 = vector.shape_cast %82 : vector<1x1x128xf32> to vector<128xf32>
    %84 = vector.shape_cast %83 : vector<128xf32> to vector<1x1x128xf32>
    %85 = vector.broadcast %84 : vector<1x1x128xf32> to vector<8x16x128xf32>
    %86 = arith.mulf %81, %85 : vector<8x16x128xf32>
    %87 = arith.addf %80, %86 : vector<8x16x128xf32>
    %c1_60 = arith.constant 1 : index
    %c0_61 = arith.constant 0 : index
    %c0_62 = arith.constant 0 : index
    %88 = vector.load %arg10[%c1_60, %c0_61, %c0_62] : memref<10x18x128xf32, #tpu.memory_space<vmem>>, vector<8x16x128xf32>
    %c1_63 = arith.constant 1 : index
    %c0_64 = arith.constant 0 : index
    %c0_65 = arith.constant 0 : index
    %89 = vector.load %arg5[%c1_63, %c0_64, %c0_65] : memref<3x3x128xf32, #tpu.memory_space<vmem>>, vector<1x1x128xf32>
    %90 = vector.shape_cast %89 : vector<1x1x128xf32> to vector<128xf32>
    %91 = vector.shape_cast %90 : vector<128xf32> to vector<1x1x128xf32>
    %92 = vector.broadcast %91 : vector<1x1x128xf32> to vector<8x16x128xf32>
    %93 = arith.mulf %88, %92 : vector<8x16x128xf32>
    %94 = arith.addf %87, %93 : vector<8x16x128xf32>
    %c1_66 = arith.constant 1 : index
    %c1_67 = arith.constant 1 : index
    %c0_68 = arith.constant 0 : index
    %95 = vector.load %arg10[%c1_66, %c1_67, %c0_68] : memref<10x18x128xf32, #tpu.memory_space<vmem>>, vector<8x16x128xf32>
    %c1_69 = arith.constant 1 : index
    %c1_70 = arith.constant 1 : index
    %c0_71 = arith.constant 0 : index
    %96 = vector.load %arg5[%c1_69, %c1_70, %c0_71] : memref<3x3x128xf32, #tpu.memory_space<vmem>>, vector<1x1x128xf32>
    %97 = vector.shape_cast %96 : vector<1x1x128xf32> to vector<128xf32>
    %98 = vector.shape_cast %97 : vector<128xf32> to vector<1x1x128xf32>
    %99 = vector.broadcast %98 : vector<1x1x128xf32> to vector<8x16x128xf32>
    %100 = arith.mulf %95, %99 : vector<8x16x128xf32>
    %101 = arith.addf %94, %100 : vector<8x16x128xf32>
    %c1_72 = arith.constant 1 : index
    %c2_73 = arith.constant 2 : index
    %c0_74 = arith.constant 0 : index
    %102 = vector.load %arg10[%c1_72, %c2_73, %c0_74] : memref<10x18x128xf32, #tpu.memory_space<vmem>>, vector<8x16x128xf32>
    %c1_75 = arith.constant 1 : index
    %c2_76 = arith.constant 2 : index
    %c0_77 = arith.constant 0 : index
    %103 = vector.load %arg5[%c1_75, %c2_76, %c0_77] : memref<3x3x128xf32, #tpu.memory_space<vmem>>, vector<1x1x128xf32>
    %104 = vector.shape_cast %103 : vector<1x1x128xf32> to vector<128xf32>
    %105 = vector.shape_cast %104 : vector<128xf32> to vector<1x1x128xf32>
    %106 = vector.broadcast %105 : vector<1x1x128xf32> to vector<8x16x128xf32>
    %107 = arith.mulf %102, %106 : vector<8x16x128xf32>
    %108 = arith.addf %101, %107 : vector<8x16x128xf32>
    %c2_78 = arith.constant 2 : index
    %c0_79 = arith.constant 0 : index
    %c0_80 = arith.constant 0 : index
    %109 = vector.load %arg10[%c2_78, %c0_79, %c0_80] : memref<10x18x128xf32, #tpu.memory_space<vmem>>, vector<8x16x128xf32>
    %c2_81 = arith.constant 2 : index
    %c0_82 = arith.constant 0 : index
    %c0_83 = arith.constant 0 : index
    %110 = vector.load %arg5[%c2_81, %c0_82, %c0_83] : memref<3x3x128xf32, #tpu.memory_space<vmem>>, vector<1x1x128xf32>
    %111 = vector.shape_cast %110 : vector<1x1x128xf32> to vector<128xf32>
    %112 = vector.shape_cast %111 : vector<128xf32> to vector<1x1x128xf32>
    %113 = vector.broadcast %112 : vector<1x1x128xf32> to vector<8x16x128xf32>
    %114 = arith.mulf %109, %113 : vector<8x16x128xf32>
    %115 = arith.addf %108, %114 : vector<8x16x128xf32>
    %c2_84 = arith.constant 2 : index
    %c1_85 = arith.constant 1 : index
    %c0_86 = arith.constant 0 : index
    %116 = vector.load %arg10[%c2_84, %c1_85, %c0_86] : memref<10x18x128xf32, #tpu.memory_space<vmem>>, vector<8x16x128xf32>
    %c2_87 = arith.constant 2 : index
    %c1_88 = arith.constant 1 : index
    %c0_89 = arith.constant 0 : index
    %117 = vector.load %arg5[%c2_87, %c1_88, %c0_89] : memref<3x3x128xf32, #tpu.memory_space<vmem>>, vector<1x1x128xf32>
    %118 = vector.shape_cast %117 : vector<1x1x128xf32> to vector<128xf32>
    %119 = vector.shape_cast %118 : vector<128xf32> to vector<1x1x128xf32>
    %120 = vector.broadcast %119 : vector<1x1x128xf32> to vector<8x16x128xf32>
    %121 = arith.mulf %116, %120 : vector<8x16x128xf32>
    %122 = arith.addf %115, %121 : vector<8x16x128xf32>
    %c2_90 = arith.constant 2 : index
    %c2_91 = arith.constant 2 : index
    %c0_92 = arith.constant 0 : index
    %123 = vector.load %arg10[%c2_90, %c2_91, %c0_92] : memref<10x18x128xf32, #tpu.memory_space<vmem>>, vector<8x16x128xf32>
    %c2_93 = arith.constant 2 : index
    %c2_94 = arith.constant 2 : index
    %c0_95 = arith.constant 0 : index
    %124 = vector.load %arg5[%c2_93, %c2_94, %c0_95] : memref<3x3x128xf32, #tpu.memory_space<vmem>>, vector<1x1x128xf32>
    %125 = vector.shape_cast %124 : vector<1x1x128xf32> to vector<128xf32>
    %126 = vector.shape_cast %125 : vector<128xf32> to vector<1x1x128xf32>
    %127 = vector.broadcast %126 : vector<1x1x128xf32> to vector<8x16x128xf32>
    %128 = arith.mulf %123, %127 : vector<8x16x128xf32>
    %129 = arith.addf %122, %128 : vector<8x16x128xf32>
    %c0_96 = arith.constant 0 : index
    %c0_97 = arith.constant 0 : index
    %130 = vector.load %arg6[%c0_96, %c0_97] : memref<1x128xf32, #tpu.memory_space<vmem>>, vector<1x128xf32>
    %131 = vector.shape_cast %130 : vector<1x128xf32> to vector<128xf32>
    %132 = vector.shape_cast %131 : vector<128xf32> to vector<1x1x128xf32>
    %133 = vector.broadcast %132 : vector<1x1x128xf32> to vector<8x16x128xf32>
    %134 = arith.addf %129, %133 : vector<8x16x128xf32>
    %cst_98 = arith.constant 0.000000e+00 : f32
    %cst_99 = arith.constant 6.000000e+00 : f32
    %135 = vector.broadcast %cst_98 : f32 to vector<8x16x128xf32>
    %136 = arith.maximumf %135, %134 : vector<8x16x128xf32>
    %137 = vector.broadcast %cst_99 : f32 to vector<8x16x128xf32>
    %138 = arith.minimumf %137, %136 : vector<8x16x128xf32>
    %139 = vector.shape_cast %138 : vector<8x16x128xf32> to vector<128x128xf32>
    %140 = arith.truncf %139 : vector<128x128xf32> to vector<128x128xbf16>
    %c0_100 = arith.constant 0 : index
    %c0_101 = arith.constant 0 : index
    %141 = vector.load %arg7[%c0_100, %c0_101] : memref<128x128xbf16, #tpu.memory_space<vmem>>, vector<128x128xbf16>
    %cst_102 = arith.constant dense<0.000000e+00> : vector<128x128xf32>
    %142 = tpu.matmul %140, %141, %cst_102 {dimension_numbers = #tpu.dot_dimension_numbers<[1], [0], [0], [1], [0, 0, 1, 1], [], []>} : vector<128x128xbf16>, vector<128x128xbf16>, vector<128x128xf32> -> vector<128x128xf32>
    %c0_103 = arith.constant 0 : index
    %c0_104 = arith.constant 0 : index
    %143 = vector.load %arg8[%c0_103, %c0_104] : memref<1x128xf32, #tpu.memory_space<vmem>>, vector<1x128xf32>
    %144 = vector.broadcast %143 : vector<1x128xf32> to vector<128x128xf32>
    %145 = arith.addf %142, %144 : vector<128x128xf32>
    %146 = vector.shape_cast %145 : vector<128x128xf32> to vector<8x16x128xf32>
    %c0_105 = arith.constant 0 : index
    %147 = arith.index_cast %1 : i32 to index
    %c0_106 = arith.constant 0 : index
    %c0_107 = arith.constant 0 : index
    %148 = vector.load %arg2[%c0_105, %147, %c0_106, %c0_107] : memref<1x16x16x128xf32, #tpu.memory_space<vmem>>, vector<1x8x16x128xf32>
    %149 = vector.shape_cast %148 : vector<1x8x16x128xf32> to vector<8x16x128xf32>
    %150 = arith.addf %146, %149 : vector<8x16x128xf32>
    %c0_108 = arith.constant 0 : index
    %c0_109 = arith.constant 0 : index
    %c0_110 = arith.constant 0 : index
    %c0_111 = arith.constant 0 : index
    %151 = vector.load %arg9[%c0_108, %c0_109, %c0_110, %c0_111] : memref<1x8x16x128xf32, #tpu.memory_space<vmem>>, vector<1x8x16x128xf32>
    %152 = vector.shape_cast %151 : vector<1x8x16x128xf32> to vector<8x16x128xf32>
    %153 = vector.shape_cast %150 : vector<8x16x128xf32> to vector<1x8x16x128xf32>
    tpu.vector_store %arg9[%c0_108, %c0_109, %c0_110, %c0_111], %153 {strides = array<i32>} : memref<1x8x16x128xf32, #tpu.memory_space<vmem>>, vector<1x8x16x128xf32>,
    return
  }
  func.func @transform_0(%arg0: i32, %arg1: i32) -> (i32, i32, i32, i32) {
    %c0_i32 = arith.constant 0 : i32
    %c0_i32_0 = arith.constant 0 : i32
    %c0_i32_1 = arith.constant 0 : i32
    %c0_i32_2 = arith.constant 0 : i32
    return %arg0, %c0_i32, %c0_i32_0, %c0_i32_1 : i32, i32, i32, i32
  }
  func.func @transform_1(%arg0: i32, %arg1: i32) -> (i32, i32) {
    %c0_i32 = arith.constant 0 : i32
    %c0_i32_0 = arith.constant 0 : i32
    %c0_i32_1 = arith.constant 0 : i32
    return %c0_i32, %c0_i32_0 : i32, i32
  }
  func.func @transform_2(%arg0: i32, %arg1: i32) -> (i32, i32) {
    %c0_i32 = arith.constant 0 : i32
    %c0_i32_0 = arith.constant 0 : i32
    %c0_i32_1 = arith.constant 0 : i32
    return %c0_i32, %c0_i32_0 : i32, i32
  }
  func.func @transform_3(%arg0: i32, %arg1: i32) -> (i32, i32, i32) {
    %c0_i32 = arith.constant 0 : i32
    %c0_i32_0 = arith.constant 0 : i32
    %c0_i32_1 = arith.constant 0 : i32
    %c0_i32_2 = arith.constant 0 : i32
    return %c0_i32, %c0_i32_0, %c0_i32_1 : i32, i32, i32
  }
  func.func @transform_4(%arg0: i32, %arg1: i32) -> (i32, i32) {
    %c0_i32 = arith.constant 0 : i32
    %c0_i32_0 = arith.constant 0 : i32
    %c0_i32_1 = arith.constant 0 : i32
    return %c0_i32, %c0_i32_0 : i32, i32
  }
  func.func @transform_5(%arg0: i32, %arg1: i32) -> (i32, i32) {
    %c0_i32 = arith.constant 0 : i32
    %c0_i32_0 = arith.constant 0 : i32
    %c0_i32_1 = arith.constant 0 : i32
    return %c0_i32, %c0_i32_0 : i32, i32
  }
  func.func @transform_6(%arg0: i32, %arg1: i32) -> (i32, i32) {
    %c0_i32 = arith.constant 0 : i32
    %c0_i32_0 = arith.constant 0 : i32
    %c0_i32_1 = arith.constant 0 : i32
    return %c0_i32, %c0_i32_0 : i32, i32
  }
  func.func @transform_7(%arg0: i32, %arg1: i32) -> (i32, i32, i32, i32) {
    %c0_i32 = arith.constant 0 : i32
    %c0_i32_0 = arith.constant 0 : i32
    %c0_i32_1 = arith.constant 0 : i32
    return %arg0, %arg1, %c0_i32, %c0_i32_0 : i32, i32, i32, i32
  }
}

</mosaic_0001>

<bundles_post_ra>
// kernel: tpu_custom_call.1
= control target key start
LH: loop header
LB: loop body
LE: loop exit
PB: predicated region body
PF: predicated region fallthrough
CT: control target
= control target key end

     0   :  { %s3300_s0 = inlined_call_operand.hbm [shape: f32[2,16,16,128], index: 0, kind: input, shape index: {}]   ;;  %s3301_s1 = inlined_call_operand.hbm [shape: bf16[128,128], index: 1, kind: input, shape index: {}]   ;;  %s3302_s2 = inlined_call_operand.vmem [shape: f32[1,128], index: 2, kind: input, shape index: {}]   ;;  %s3303_s3 = inlined_call_operand.hbm [shape: f32[3,3,128], index: 3, kind: input, shape index: {}]   ;;  %s3304_s4 = inlined_call_operand.vmem [shape: f32[1,128], index: 4, kind: input, shape index: {}]   ;;  %s3305_s5 = inlined_call_operand.hbm [shape: bf16[128,128], index: 5, kind: input, shape index: {}]   ;;  %s3306_s6 = inlined_call_operand.vmem [shape: f32[1,128], index: 6, kind: input, shape index: {}]   ;;  %s3307_s7 = inlined_call_operand.hbm [shape: f32[2,16,16,128], index: 7, kind: output, shape index: {}]  }
   0x1   :  { %3320 = sst [smem:[#allocation23_spill]] %s3301_s1 }
   0x2   :  { %3321 = sst [smem:[#allocation24_spill]] %s3303_s3 }
   0x3   :  { %3322 = sst [smem:[#allocation25_spill]] %s3305_s5 }
   0x4   :  { %3323 = sst [smem:[#allocation26_spill]] %s3307_s7 }
   0x5   :  { %12 = vsyncpa [#allocation4], 0 }
   0x6   :  { %14 = vsyncpa [#allocation4 + $0x1], 0 }
   0x7   :  { %15 = vsyncpa [#allocation7], 0 }
   0x8   :  { %16 = vsyncpa [#allocation10], 0 }
   0x9   :  { %17 = vsyncpa [#allocation5], 0 }
   0xa   :  { %19 = vsyncpa [#allocation5 + $0x1], 0  ;;  %s2487_s24 = smov 0   ;;  %s2489_s25 = smov 0  }
   0xb   :  { %s2491_s26 = smov 0   ;;  %s2493_s27 = smov 0  }
   0xc   :  { %s2495_s28 = smov 0   ;;  %s2497_s29 = smov 0  }
   0xd   :  { %s2499_s30 = smov 0   ;;  %s2501_s8 = smov 0  }
   0xe   :  { %s2503_s9 = smov 0   ;;  %s2505_s10 = smov 0  }
   0xf   :  { %s2507_s11 = smov 0  }
  0x10 LB: > { %3324 = sst [smem:[#allocation16_spill]] %s2392_s24  ;;  %s1794_s12 = sadd.s32 4294967295, %s2432_s11   ;;  %s2432_s11 = sphi %s2507_s11, %s25_s11   ;;  %s2428_s10 = sphi %s2505_s10, %s3362_s10   ;;  %s2424_s9 = sphi %s2503_s9, %s3353_s9   ;;  %s2420_s8 = sphi %s2501_s8, %s3361_s8   ;;  %s2416_s30 = sphi %s2499_s30, %s3352_s30   ;;  %s2412_s29 = sphi %s2497_s29, %s3360_s29   ;;  %s2408_s28 = sphi %s2495_s28, %s3359_s28   ;;  %s2404_s27 = sphi %s2493_s27, %s3358_s27   ;;  %s2400_s26 = sphi %s2491_s26, %s3357_s26   ;;  %s2396_s25 = sphi %s2489_s25, %s3356_s25   ;;  %s2392_s24 = sphi %s2487_s24, %s3355_s24  }
  0x11   : > { %3325 = sst [smem:[#allocation17_spill]] %s2420_s8  ;;  %s1795_s13 = sadd.s32 4294967294, %s2432_s11  }
  0x12   : > { %3326 = sst [smem:[#allocation18_spill]] %s2424_s9  ;;  %p57_p0 = scmp.ne.s32.totalorder %s2408_s28, %s2404_s27 }
  0x13   : > { %p2543_p1 = scmp.eq.s32.totalorder %s1794_s12, 0  ;;  %p208_p2 = scmp.ne.s32.totalorder %s2400_s26, %s2396_s25 }
  0x14   : > { %p209_p4 = scmp.eq.s32.totalorder %s1794_s12, 3  ;;  %p214_p5 = scmp.ne.s32.totalorder %s2396_s25, %s2392_s24 }
  0x15   : > { %s3327_s14 = scalar_select %p2543_p1, 1, 0 }
  0x16   : > { %p2552_p3 = por %p2543_p1, %p57_p0  ;;  %p215_p6 = scmp.eq.s32.totalorder %s1795_s13, 3 }
  0x17   : > { %p2558_p7 = por %p209_p4, %p208_p2  ;;  %p1796_p8 = scmp.ge.s32.totalorder %s2432_s11, 1 }
  0x18   : > { %s3328_s16 = scalar_select %p2552_p3, 1, 0 }
  0x19   : > { %s3329_s17 = scalar_select %p2558_p7, 1, 0 }
  0x1a   : > { %p2563_p9 = por %p215_p6, %p214_p5  ;;  %p222_p10 = scmp.lt.s32.totalorder %s2432_s11, 5 }
  0x1b   : > { %3330 = sst [smem:[#allocation19_spill]] %s3329_s17  ;;  %s2434_s20 = smov [#allocation6]  }
  0x1c   : > { %s3331_s18 = scalar_select %p2563_p9, 1, 0 }
  0x1d   : > { %p2568_p11 = pnand %p1796_p8, %p222_p10  ;;  %s234_s21 = sshll.u32 %s2434_s20, 4  ;;  %s235_s21 = int_to_ptr.vmem [resolvable:$true] %s234_s21 }
  0x1e   : > { %3332 = sst [smem:[#allocation20_spill]] %s3331_s18  ;;  %s2435_s23 = smov [#allocation8]  }
  0x1f   : > { %p2041_p12 = pneg %p2568_p11  ;;  %s250_s27 = sshll.u32 %s2435_s23, 4  ;;  %s251_s27 = int_to_ptr.vmem [resolvable:$true] %s250_s27 }
  0x20   : > { %s2436_s12 = smov [#allocation9]   ;;  %s2209_s15 = scalar_lea.vmem %s235_s21, 1024 }
  0x21   : > { %p2576_p13 = pnand %p2041_p12, %p2543_p1  ;;  %s266_s13 = sshll.u32 %s2436_s12, 4  ;;  %s267_s13 = int_to_ptr.vmem [resolvable:$true] %s266_s13 }
  0x22   : > { %p2210_p2 = scmp.ne.s32.totalorder %s235_s21, %s2209_s15  ;;  %p2217_p6 = scmp.lt.s32.totalorder %s235_s21, %s235_s21 }
  0x23   : > { %p2200_p0 = pneg %p2576_p13  ;;  %p2218_p8 = scmp.lt.s32.totalorder %s2209_s15, %s2209_s15 }
  0x25   : > { %p2212_p4 = pnand %p2210_p2, %p2200_p0  ;;  %p2219_p10 = por %p2218_p8, %p2217_p6 }
  0x27   : > { %p2213_p5 = pneg %p2212_p4 }
  0x29   : > { %p2220_p12 = pnand %p2219_p10, %p2213_p5 }
  0x2b   : > { %2223 = shalt.err (!%p2220_p12)
}
  0x2c   : > { %s2437_s20 = smov 64   ;;  %s2438_s23 = smov 4  }
  0x2d   : > { %s3335_s1 = sld [smem:[#allocation23_spill]]  ;;  %s2235_s24 = scalar_lea.vmem %s251_s27, 192 }
  0x2e   : > { %p2236_p9 = scmp.ne.s32.totalorder %s251_s27, %s2235_s24  ;;  %p2243_p7 = scmp.lt.s32.totalorder %s251_s27, %s251_s27 }
  0x2f   : > { %p2244_p1 = scmp.lt.s32.totalorder %s2235_s24, %s2235_s24 }
  0x30   : > { %p2238_p2 = pnand %p2236_p9, %p2200_p0 }
  0x31   : > { %p2245_p6 = por %p2244_p1, %p2243_p7 }
  0x32   : > { %p2239_p4 = pneg %p2238_p2 }
  0x33   : > { %2044 = dma.hbm_to_vmem [thread:$0]  (!%p2576_p13), %s3335_s1, 1024, %s235_s21, [#allocation7], %s2437_s20, %s2437_s20, %s2438_s23  }
  0x34   : > { %p2246_p5 = pnand %p2245_p6, %p2239_p4 }
  0x36   : > { %2249 = shalt.err (!%p2246_p5)
}
  0x37   : > { %s3336_s3 = sld [smem:[#allocation24_spill]]  ;;  %s2261_s18 = scalar_lea.vmem %s267_s13, 1024 }
  0x38   : > { %p2262_p8 = scmp.ne.s32.totalorder %s267_s13, %s2261_s18  ;;  %p2269_p12 = scmp.lt.s32.totalorder %s267_s13, %s267_s13 }
  0x39   : > { %p2270_p2 = scmp.lt.s32.totalorder %s2261_s18, %s2261_s18 }
  0x3a   : > { %p2264_p10 = pnand %p2262_p8, %p2200_p0 }
  0x3b   : > { %p2271_p3 = por %p2270_p2, %p2269_p12 }
  0x3c   : > { %p2265_p9 = pneg %p2264_p10 }
  0x3d   : > { %2047 = dma.hbm_to_vmem [thread:$0]  (!%p2576_p13), %s3336_s3, 192, %s251_s27, [#allocation7], %s2437_s20, %s2437_s20, %s2438_s23  }
  0x3e   : > { %p2272_p1 = pnand %p2271_p3, %p2265_p9 }
  0x40   : > { %2275 = shalt.err (!%p2272_p1)
}
  0x41   : > { %s3337_s5 = sld [smem:[#allocation25_spill]]  ;;  %s34_s7 = sadd.s32 1, %s2424_s9 }
  0x42   : > { %p35_p3 = scmp.ge.s32.totalorder %s34_s7, 2  ;;  %s37_s27 = sadd.s32 1, %s2428_s10 }
  0x43   : > { %s44_s12 = sadd.s32 1, %s2412_s29  ;;  %p51_p7 = scmp.ne.s32.totalorder %s2412_s29, %s2408_s28 }
  0x44   : > { %s3364_s7 = smov (%p35_p3, %s34_s7), 0  ;;  %s3366_s27 = smov (!%p35_p3, %s37_s27), %s2428_s10 }
  0x45   : > { %3338 = sst [smem:[#allocation21_spill]] %s3364_s7  ;;  %p52_p0 = scmp.eq.s32.totalorder %s2432_s11, 0 }
  0x46   : > { %s194_s22 = ssub.s32 %s2424_s9, %s3364_s7  ;;  %p39_p4 = scmp.ge.s32.totalorder %s3366_s27, 2 }
  0x47   : > { %2050 = dma.hbm_to_vmem [thread:$0]  (!%p2576_p13), %s3337_s5, 1024, %s267_s13, [#allocation10], %s2437_s20, %s2437_s20, %s2438_s23  }
  0x48   : > { %p2062_p6 = scmp.lt.s32.totalorder %s2432_s11, 4  ;;  %p2618_p13 = por %p52_p0, %p51_p7 }
  0x49   : > { %s283_s20 = sand.u32 1, %s2412_s29   ;;  %s3368_s27 = smov (%p39_p4, %s3366_s27), 0 }
  0x4a   : > { %3340 = sst [smem:[#allocation22_spill]] %s3368_s27  ;;  %s1801_s23 = sshll.u32 %s283_s20, 8 }
  0x4b   : > { %s41_s15 = ssub.s32 %s2428_s10, %s3368_s27  ;;  %s1868_s24 = sshll.u32 %s2428_s10, 12 }
  0x4c   : > { %p42_p5 = scmp.eq.s32.totalorder %s41_s15, 0  ;;  %s195_s18 = sor.u32 %s194_s22, %s41_s15 }
  0x4d   : > { %p196_p8 = scmp.eq.s32.totalorder %s195_s18, 0  ;;  %s3341_s1 = sadd.s32 1, %s2400_s26 }
  0x4e   : > { %s2629_s21 = scalar_select %p42_p5, %s2412_s29, %s44_s12  }
  0x4f   : > { %s2634_s3 = scalar_select %p196_p8, %s2400_s26, %s3341_s1  }
  0x50   : > { %s293_s9 = scalar_lea.hbm %s3300_s0, %s1868_s24  ;;  %s287_s17 = scalar_lea.vmem [#allocation3], %s1801_s23 }
  0x51   : > { %s294_s8 = sshll.u32 %s287_s17, 4  ;;  %p2643_p10 = pnand %p2062_p6, %p2618_p13  ;;  %s295_s8 = int_to_ptr.vmem [resolvable:$true] %s294_s8 }
  0x52   : > { %s284_s22 = scalar_lea.sflag [#allocation4], %s283_s20  ;;  %s2289_s12 = scalar_lea.vmem %s295_s8, 4096 }
  0x53   : > { %p2278_p9 = pneg %p2643_p10  ;;  %p2290_p12 = scmp.ne.s32.totalorder %s295_s8, %s2289_s12 }
  0x54   : > { %s2439_s1 = smov [#allocation3]  }
  0x55   : > { %p2292_p2 = pnand %p2290_p12, %p2278_p9  ;;  %s2294_s5 = sshll.u32 %s2439_s1, 4  ;;  %s2295_s5 = int_to_ptr.vmem [resolvable:$false] %s2294_s5 }
  0x56   : > { %s2296_s7 = scalar_lea.vmem %s2295_s5, 8192  ;;  %p2297_p3 = scmp.lt.s32.totalorder %s295_s8, %s2295_s5 }
  0x57   : > { %p2293_p1 = pneg %p2292_p2  ;;  %p2298_p7 = scmp.lt.s32.totalorder %s2296_s7, %s2289_s12 }
  0x59   : > { %p2299_p0 = por %p2298_p7, %p2297_p3 }
  0x5b   : > { %p2300_p4 = pnand %p2299_p0, %p2293_p1 }
  0x5d   : > { %2303 = shalt.err (!%p2300_p4)
}
  0x5e   : > { %s2440_s17 = smov 128   ;;  %s2441_s13 = smov 8  }
  0x5f   : > { %2054 = dma.hbm_to_vmem [thread:$0]  (!%p2643_p10), %s293_s9, 4096, %s295_s8, %s284_s22, %s2440_s17, %s2440_s17, %s2441_s13  }
  0x60   : > { %306 = sbr.rel (%p2568_p11) target bundleno = 664 (0x298), region = 48  ;;  %s308_s20 = sand.u32 (!%p2568_p11), 1, %s2408_s28  }
  0x61   : > { %s1805_s23 = sshll.u32 (!%p2568_p11), %s308_s20, 8  ;;  %s309_s15 = scalar_lea.sflag (!%p2568_p11), [#allocation4], %s308_s20 }
  0x62   : > { %s2654_s18 = scalar_lea.vmem (!%p2568_p11), [#allocation3], %s1805_s23  ;;  %p3343_p6 = scmp.ne.s32.totalorder (!%p2568_p11), %s3328_s16, 0 }
  0x65   : > { %2375 = dma.done.wait (%p3343_p6), %s309_s15, 4096  }
  0x66   : > { %2377 = vsyncadd (%p3343_p6), %s309_s15, 4294963200  ;;  %p3344_p13 = scmp.ne.s32.totalorder %s3327_s14, 0 }
  0x68   : > { %2379 = dma.done.wait (%p3344_p13), [#allocation7], 1216  }
  0x69   : > { %2381 = vsyncadd (%p3344_p13), [#allocation7], 4294966080 }
  0x6a   : > { %2383 = dma.done.wait (%p3344_p13), [#allocation10], 1024  }
  0x6b   : > { %2385 = vsyncadd (%p3344_p13), [#allocation10], 4294966272  ;;  %v2442_v0 = vmov 0.0   ;;  %vm2443_vm0 = vmmov 0   ;;  %v2166_v1 = vld [vmem:[#allocation6 + $0x38] sm:$0xff]   ;;  %v2168_v3 = vld [vmem:[#allocation6 + $0x30] sm:$0xff]  }
  0x6c   : > { %1953 = vmatprep.subr.bf16.mxu1 %v2442_v0  ;;  %358 = vst [vmem:[#allocation2] sm:$0xff] %v2442_v0  ;;  %359 = vst [vmem:[#allocation2 + $0x8] sm:$0xff] %v2442_v0  ;;  %1969 = vmatprep.mubr.msk.bf16.mxu1 %vm2443_vm0, %v2442_v0  ;;  %v2167_v2 = vld [vmem:[#allocation6 + $0x38] sm:$0xff]   ;;  %v2169_v4 = vld [vmem:[#allocation6 + $0x30] sm:$0xff]   ;;  %s1810_s8 = sshll.u32 %s2416_s30, 3  ;;  %s1869_s14 = sshll.u32 %s2416_s30, 7 }
  0x6d   : > { %360 = vst [vmem:[#allocation2 + $0x10] sm:$0x3] %v2442_v0  ;;  %361 = vst [vmem:[#allocation2 + $0x18] sm:$0xff] %v2442_v0  ;;  %1921 = vmatprep.subr.bf16.mxu0 %v2166_v1  ;;  %1954 = vmatpush3.bf16.msra.mxu1 %v2167_v2  ;;  %v2170_v5 = vld [vmem:[#allocation6 + $0x28] sm:$0xff]   ;;  %v2172_v7 = vld [vmem:[#allocation6 + $0x20] sm:$0xff]   ;;  %s1821_s9 = sadd.s32 4294967295, %s1810_s8  ;;  %s2709_s16 = scalar_lea.vmem %s2654_s18, %s1869_s14 [#allocation3] }
  0x6e   : > { %362 = vst [vmem:[#allocation2 + $0x20] sm:$0xff] %v2442_v0  ;;  %363 = vst [vmem:[#allocation2 + $0x28] sm:$0x3] %v2442_v0  ;;  %1922 = vmatpush3.bf16.msra.mxu0 %v2166_v1  ;;  %1955 = vmatprep.subr.bf16.mxu1 %v2442_v0  ;;  %v2171_v6 = vld [vmem:[#allocation6 + $0x28] sm:$0xff]   ;;  %v2173_v8 = vld [vmem:[#allocation6 + $0x20] sm:$0xff]   ;;  %p632_p11 = scmp.gt.s32.totalorder %s1821_s9, 0 }
  0x6f   : > { %364 = vst [vmem:[#allocation2 + $0x30] sm:$0xff] %v2442_v0  ;;  %365 = vst [vmem:[#allocation2 + $0x38] sm:$0xff] %v2442_v0  ;;  %1923 = vmatprep.subr.bf16.mxu0 %v2168_v3  ;;  %v2174_v9 = vld [vmem:[#allocation6 + $0x18] sm:$0xff]   ;;  %v2176_v11 = vld [vmem:[#allocation6 + $0x10] sm:$0xff]   ;;  %s763_s24 = sadd.s32 8, %s1810_s8  ;;  %p755_p8 = scmp.gt.s32.totalorder %s2416_s30, 0 }
  0x70   : > { %366 = vst [vmem:[#allocation2 + $0x40] sm:$0x3] %v2442_v0  ;;  %367 = vst [vmem:[#allocation2 + $0x48] sm:$0xff] %v2442_v0  ;;  %v2175_v10 = vld [vmem:[#allocation6 + $0x18] sm:$0xff]   ;;  %v390_v12 = vld [vmem:[%s2709_s16] sm:$0xff]  ;;  %s3370_s9 = smov (!%p632_p11, %s1821_s9), 0 }
  0x71   : > { %368 = vst [vmem:[#allocation2 + $0x50] sm:$0xff] %v2442_v0  ;;  %369 = vst [vmem:[#allocation2 + $0x58] sm:$0x3] %v2442_v0  ;;  %1956 = vmatpush3.bf16.msra.mxu1 %v2169_v4  ;;  %v391_v13 = vld [vmem:[%s2709_s16 + $0x8] sm:$0xff]  ;;  %v2177_v15 = vld [vmem:[#allocation6 + $0x10] sm:$0xff]   ;;  %s1822_s19 = sshll.u32 %s3370_s9, 4 }
  0x72   : > { %370 = vst [vmem:[#allocation2 + $0x60] sm:$0xff] %v2442_v0  ;;  %371 = vst [vmem:[#allocation2 + $0x68] sm:$0xff] %v2442_v0  ;;  %1924 = vmatpush3.bf16.msra.mxu0 %v2168_v3  ;;  %1957 = vmatprep.subr.bf16.mxu1 %v2442_v0  ;;  %v406_v14 = vpack.c.bf16 %v391_v13, %v390_v12  ;;  %v2178_v16 = vld [vmem:[#allocation6 + $0x8] sm:$0xff]   ;;  %s635_s27 = scalar_lea.vmem %s2654_s18, %s1822_s19 [#allocation3]  ;;  %v2180_v18 = vld [vmem:[#allocation6] sm:$0xff]   ;;  %p764_p5 = scmp.lt.s32.totalorder %s763_s24, 15 }
  0x73   : > { %372 = vst [vmem:[#allocation2 + $0x70] sm:$0x3] %v2442_v0  ;;  %373 = vst [vmem:[#allocation2 + $0x78] sm:$0xff] %v2442_v0  ;;  %1925 = vmatprep.subr.bf16.mxu0 %v2170_v5  ;;  %v2179_v17 = vld [vmem:[#allocation6 + $0x8] sm:$0xff]   ;;  %v2181_v19 = vld [vmem:[#allocation6] sm:$0xff]   ;;  %p887_p10 = scmp.lt.s32.totalorder %s2416_s30, 1 }
  0x74   : > { %374 = vst [vmem:[#allocation2 + $0x80] sm:$0xff] %v2442_v0  ;;  %375 = vst [vmem:[#allocation2 + $0x88] sm:$0x3] %v2442_v0  ;;  %1937 = vmatprep.mubr.bf16.mxu0 %v406_v14  ;;  %v636_v20 = vld [vmem:[%s635_s27] sm:$0xff]  ;;  %v637_v21 = vld [vmem:[%s635_s27 + $0x8] sm:$0xff]  ;;  %s3372_s24 = smov (!%p764_p5, %s763_s24), 15 }
  0x75   : > { %376 = vst [vmem:[#allocation2 + $0x90] sm:$0xff] %v2442_v0  ;;  %377 = vst [vmem:[#allocation2 + $0x98] sm:$0xff] %v2442_v0  ;;  %1958 = vmatpush3.bf16.msra.mxu1 %v2171_v6  ;;  %v392_v22 = vld [vmem:[%s2709_s16 + $0x10] sm:$0xff]  ;;  %v393_v23 = vld [vmem:[%s2709_s16 + $0x18] sm:$0xff]  ;;  %v638_v26 = vpack.c.bf16 %v637_v21, %v636_v20  ;;  %s1832_s22 = sshll.u32 %s3372_s24, 4  ;;  %s3345_s27 = sld [smem:[#allocation17_spill]] }
  0x76   : > { %378 = vst [vmem:[#allocation2 + $0xa0] sm:$0x3] %v2442_v0  ;;  %379 = vst [vmem:[#allocation2 + $0xa8] sm:$0xff] %v2442_v0  ;;  %1926 = vmatpush3.bf16.msra.mxu0 %v2170_v5  ;;  %1959 = vmatprep.subr.bf16.mxu1 %v2442_v0  ;;  %v394_v24 = vld [vmem:[%s2709_s16 + $0x20] sm:$0xff]  ;;  %v395_v25 = vld [vmem:[%s2709_s16 + $0x28] sm:$0xff]  ;;  %v407_v27 = vpack.c.bf16 %v393_v23, %v392_v22  ;;  %s767_s12 = scalar_lea.vmem %s2654_s18, %s1832_s22 [#allocation3]  ;;  %s352_s18 = sand.u32 1, %s2396_s25  }
  0x77   : > { %380 = vst [vmem:[#allocation2 + $0xb0] sm:$0xff] %v2442_v0  ;;  %381 = vst [vmem:[#allocation2 + $0xb8] sm:$0x3] %v2442_v0  ;;  %1927 = vmatprep.subr.bf16.mxu0 %v2172_v7  ;;  %v2182_v28 = vld [vmem:[#allocation6 + $0x38] sm:$0xff]   ;;  %v408_v29 = vpack.c.bf16 %v395_v25, %v394_v24  ;;  %v2183_v30 = vld [vmem:[#allocation6 + $0x30] sm:$0xff]   ;;  %s1809_s14 = sshll.u32 %s352_s18, 7 }
  0x78   : > { %382 = vst [vmem:[#allocation2 + $0xc0] sm:$0xff] %v2442_v0  ;;  %383 = vst [vmem:[#allocation2 + $0xc8] sm:$0xff] %v2442_v0  ;;  %v396_v31 = vld [vmem:[%s2709_s16 + $0x30] sm:$0xff]  ;;  %v397_v32 = vld [vmem:[%s2709_s16 + $0x38] sm:$0xff]  ;;  %s756_s1 = scalar_select %p755_p8, 1, 0 }
  0x79   : > { %384 = vst [vmem:[#allocation2 + $0xd0] sm:$0x3] %v2442_v0  ;;  %385 = vst [vmem:[#allocation2 + $0xd8] sm:$0xff] %v2442_v0  ;;  %1960 = vmatpush3.bf16.msra.mxu1 %v2173_v8  ;;  %v398_v33 = vld [vmem:[%s2709_s16 + $0x40] sm:$0xff]  ;;  %v399_v34 = vld [vmem:[%s2709_s16 + $0x48] sm:$0xff]  ;;  %v409_v35 = vpack.c.bf16 %v397_v32, %v396_v31  ;;  %s3183_s19 = scalar_lea.vmem [#allocation11], %s1809_s14 }
  0x7a   : > { %386 = vst [vmem:[#allocation2 + $0xe0] sm:$0xff] %v2442_v0  ;;  %387 = vst [vmem:[#allocation2 + $0xe8] sm:$0x3] %v2442_v0  ;;  %1928 = vmatpush3.bf16.msra.mxu0 %v2172_v7  ;;  %1961 = vmatprep.subr.bf16.mxu1 %v2442_v0  ;;  %v2184_v36 = vld [vmem:[#allocation6 + $0x28] sm:$0xff]   ;;  %v410_v37 = vpack.c.bf16 %v399_v34, %v398_v33  ;;  %v2185_v38 = vld [vmem:[#allocation6 + $0x20] sm:$0xff]   ;;  %s757_s17 = scvt.s32.f32 %s756_s1  ;;  %s1870_s24 = sshll.u32 %s2416_s30, 4 }
  0x7b   : > { %1929 = vmatprep.subr.bf16.mxu0 %v2174_v9  ;;  %v400_v39 = vld [vmem:[%s2709_s16 + $0x50] sm:$0xff]  ;;  %v401_v40 = vld [vmem:[%s2709_s16 + $0x58] sm:$0xff]  ;;  %v402_v41 = vld [vmem:[%s2709_s16 + $0x60] sm:$0xff]  ;;  %s2754_s13 = scalar_select %p887_p10, 1, 0 }
  0x7c   : > { %v403_v42 = vld [vmem:[%s2709_s16 + $0x68] sm:$0xff]  ;;  %v411_v43 = vpack.c.bf16 %v401_v40, %v400_v39  ;;  %v2187_v46 = vld [vmem:[#allocation6 + $0x10] sm:$0xff]   ;;  %v404_v47 = vld [vmem:[%s2709_s16 + $0x70] sm:$0xff]  ;;  %s1864_s22 = sshll.u32 %s3345_s27, 5  ;;  %s3346_s30 = sld [smem:[#allocation19_spill]] }
  0x7d   : > { %1962 = vmatpush3.bf16.msra.mxu1 %v2175_v10  ;;  %v2186_v44 = vld [vmem:[#allocation6 + $0x18] sm:$0xff]   ;;  %v412_v45 = vpack.c.bf16 %v403_v42, %v402_v41  ;;  %v405_v48 = vld [vmem:[%s2709_s16 + $0x78] sm:$0xff]  ;;  %v768_v51 = vld [vmem:[%s767_s12] sm:$0xff]  ;;  %s889_s20 = scvt.s32.f32 %s2754_s13  ;;  %s1672_s5 = sshll.u32 %s3183_s19, 4  ;;  %s3234_s5 = int_to_ptr.vmem [resolvable:$true] %s1672_s5 }
  0x7e   : > { %1930 = vmatpush3.bf16.msra.mxu0 %v2174_v9  ;;  %1963 = vmatprep.subr.bf16.mxu1 %v2442_v0  ;;  %v413_v49 = vpack.c.bf16 %v405_v48, %v404_v47  ;;  %v2188_v50 = vld [vmem:[#allocation6 + $0x8] sm:$0xff]   ;;  %v769_v52 = vld [vmem:[%s767_s12 + $0x8] sm:$0xff]  ;;  %v2189_v53 = vld [vmem:[#allocation6] sm:$0xff]   ;;  %v758_v9 = vstv %s757_s17  ;;  %s1669_s12 = sadd.s32 %s1870_s24, %s1864_s22  ;;  %s3347_s13 = sld [smem:[#allocation26_spill]] }
  0x7f   : > { %1931 = vmatprep.subr.bf16.mxu0 %v2176_v11  ;;  %v770_v54 = vpack.c.bf16 %v769_v52, %v768_v51  ;;  %v2190_v55 = vld [vmem:[#allocation9 + $0x38] sm:$0xff]   ;;  %v2191_v56 = vld [vmem:[#allocation9 + $0x30] sm:$0xff]   ;;  %v2192_v57 = vld [vmem:[#allocation9 + $0x28] sm:$0xff]   ;;  %v2768_v33 = vstv %s889_s20  ;;  %s1865_s1 = sshll.u32 %s1669_s12, 7  ;;  %s3240_s23 = scalar_lea.sflag [#allocation5], %s352_s18 }
  0x80   : > { %v2193_v58 = vld [vmem:[#allocation9 + $0x20] sm:$0xff]   ;;  %v2194_v59 = vld [vmem:[#allocation9 + $0x18] sm:$0xff]   ;;  %v2195_v60 = vld [vmem:[#allocation9 + $0x10] sm:$0xff]   ;;  %s2444_s15 = smov [#allocation11]  }
  0x81   : > { %1964 = vmatpush3.bf16.msra.mxu1 %v2177_v15  ;;  %v2196_v61 = vld [vmem:[#allocation9 + $0x8] sm:$0xff]   ;;  %v2197_v62 = vld [vmem:[#allocation9] sm:$0xff]   ;;  %v2761_v23 = vld [vmem:[#allocation8 + $0x5] ss:$0 sm:$0xff]  ;;  %s2308_s8 = sshll.u32 %s2444_s15, 4  ;;  %s2309_s8 = int_to_ptr.vmem [resolvable:$false] %s2308_s8 }
  0x82   : > { %1932 = vmatpush3.bf16.msra.mxu0 %v2176_v11  ;;  %1965 = vmatprep.subr.bf16.mxu1 %v2442_v0  ;;  %v2749_v63 = vld [vmem:[%s3302_s2] ss:$0 sm:$0xff]  ;;  %v2763_v24 = vld [vmem:[#allocation8 + $0x9] ss:$0 sm:$0xff]  ;;  %v2777_v41 = vld [vmem:[#allocation8] ss:$0 sm:$0xff]  ;;  %p2311_p3 = scmp.lt.s32.totalorder %s3234_s5, %s2309_s8 }
  0x83   : > { %1933 = vmatprep.subr.bf16.mxu0 %v2178_v16  ;;  %p3348_p12 = scmp.ne.s32.totalorder %s3346_s30, 0  ;;  %s2310_s9 = scalar_lea.vmem %s2309_s8, 4096 }
  0x84   : > { %s3232_s20 = scalar_lea.hbm %s3347_s13, %s1865_s1 }
  0x85   : > { %1966 = vmatpush3.bf16.msra.mxu1 %v2179_v17 }
  0x86   : > { %1934 = vmatpush3.bf16.msra.mxu0 %v2178_v16  ;;  %1967 = vmatprep.subr.bf16.mxu1 %v2442_v0 }
  0x87   : > { %1935 = vmatprep.subr.bf16.mxu0 %v2180_v18 }
  0x89   : > { %1968 = vmatpush3.bf16.msra.mxu1 %v2181_v19 }
  0x8a   : > { %1936 = vmatpush3.bf16.msra.mxu0 %v2180_v18  ;;  %1993 = vmatprep.subr.bf16.mxu1 %v2190_v55 }
  0x8b   : > { %1973 = vmatprep.subr.bf16.mxu0 %v2442_v0 }
  0x8c   : > { %1970 = vmatmul.mubr.bf16.vlgmr.msra.gmra.mxu1 %v638_v26 }
  0x8d   : > { %1938 = vmatmul.mubr.bf16.vlgmr.msra.gmra.mxu0 %v407_v27  ;;  %1994 = vmatpush3.bf16.msra.mxu1 %v2190_v55 }
  0x8e   : > { %1974 = vmatpush3.bf16.msra.mxu0 %v2182_v28  ;;  %1941 = vmatprep.mubr.bf16.mxu0 %v408_v29 }
  0x8f   : > { %1975 = vmatprep.subr.bf16.mxu0 %v2442_v0  ;;  %1995 = vmatprep.subr.bf16.mxu1 %v2191_v56 }
  0x91   : > { %1996 = vmatpush3.bf16.msra.mxu1 %v2191_v56 }
  0x92   : > { %1976 = vmatpush3.bf16.msra.mxu0 %v2183_v30  ;;  %1997 = vmatprep.subr.bf16.mxu1 %v2192_v57  ;;  %v2766_v30 = vld [vmem:[#allocation8 + $0x1] ss:$0 sm:$0xff] }
  0x93   : > { %1977 = vmatprep.subr.bf16.mxu0 %v2442_v0 }
  0x95   : > { %1942 = vmatmul.mubr.bf16.gmra.mxu0 %v409_v35  ;;  %1998 = vmatpush3.bf16.msra.mxu1 %v2192_v57 }
  0x96   : > { %1978 = vmatpush3.bf16.msra.mxu0 %v2184_v36  ;;  %1945 = vmatprep.mubr.bf16.mxu0 %v410_v37 }
  0x97   : > { %1979 = vmatprep.subr.bf16.mxu0 %v2442_v0  ;;  %1999 = vmatprep.subr.bf16.mxu1 %v2193_v58 }
  0x99   : > { %2000 = vmatpush3.bf16.msra.mxu1 %v2193_v58 }
  0x9a   : > { %1980 = vmatpush3.bf16.msra.mxu0 %v2185_v38  ;;  %2001 = vmatprep.subr.bf16.mxu1 %v2194_v59 }
  0x9b   : > { %1981 = vmatprep.subr.bf16.mxu0 %v2442_v0 }
  0x9d   : > { %1946 = vmatmul.mubr.bf16.gmra.mxu0 %v411_v43  ;;  %2002 = vmatpush3.bf16.msra.mxu1 %v2194_v59 }
  0x9e   : > { %1982 = vmatpush3.bf16.msra.mxu0 %v2186_v44  ;;  %1949 = vmatprep.mubr.bf16.mxu0 %v412_v45 }
  0x9f   : > { %1983 = vmatprep.subr.bf16.mxu0 %v2442_v0  ;;  %2003 = vmatprep.subr.bf16.mxu1 %v2195_v60 }
  0xa1   : > { %2004 = vmatpush3.bf16.msra.mxu1 %v2195_v60 }
  0xa2   : > { %1984 = vmatpush3.bf16.msra.mxu0 %v2187_v46  ;;  %2005 = vmatprep.subr.bf16.mxu1 %v2196_v61 }
  0xa3   : > { %1985 = vmatprep.subr.bf16.mxu0 %v2442_v0 }
  0xa5   : > { %1950 = vmatmul.mubr.bf16.gmra.mxu0 %v413_v49  ;;  %2006 = vmatpush3.bf16.msra.mxu1 %v2196_v61  ;;  %v2788_v49 = vld [vmem:[#allocation8 + $0x4] ss:$0 sm:$0xff] }
  0xa6   : > { %1986 = vmatpush3.bf16.msra.mxu0 %v2188_v50  ;;  %1989 = vmatprep.mubr.msk.bf16.mxu0 %vm2443_vm0, %v2442_v0  ;;  %v2790_v50 = vld [vmem:[#allocation8 + $0x8] ss:$0 sm:$0xff] }
  0xa7   : > { %1987 = vmatprep.subr.bf16.mxu0 %v2442_v0  ;;  %2007 = vmatprep.subr.bf16.mxu1 %v2197_v62 }
  0xa9   : > { %2008 = vmatpush3.bf16.msra.mxu1 %v2197_v62 }
  0xaa   : > { %1988 = vmatpush3.bf16.msra.mxu0 %v2189_v53 }
  0xad   : > { %1990 = vmatmul.mubr.bf16.vlgmr.msra.gmra.mxu0 %v770_v54 }
 0x14c   : > { %v744_v0 = vpop.f32.mrf.mxu1 }
 0x14d   : > { %v1939_v1 = vpop.f32.mrf.mxu0  ;;  %v745_v2 = vadd.f32 %v2749_v63, %v744_v0 }
 0x14e   : > { %v528_v3 = vadd.f32 %v1939_v1, %v2749_v63  ;;  %v1971_v4 = vpop.f32.mrf.mxu1 }
 0x14f   : > { %v519_v5 = vpop.f32.mrf.mxu0  ;;  %v751_v6 = vmax.f32 %v745_v2, 0.0 }
 0x150   : > { %v584_v7 = vmax.f32 %v528_v3, 0.0  ;;  %v520_v8 = vadd.f32 %v2749_v63, %v519_v5  ;;  %v747_v10 = vpop.f32.mrf.mxu1 }
 0x151   : > { %v1940_v11 = vpop.f32.mrf.mxu0  ;;  %v753_v12 = vmin.f32 %v751_v6, 6.0  ;;  %v748_v15 = vadd.f32 %v2749_v63, %v747_v10  ;;  %v2830_v10 = vld [vmem:[#allocation8 + $0xa] ss:$0 sm:$0xff] }
 0x152   : > { %v600_v13 = vmin.f32 %v584_v7, 6.0  ;;  %v582_v14 = vmax.f32 %v520_v8, 0.0  ;;  %v531_v16 = vadd.f32 %v1940_v11, %v2749_v63  ;;  %v1972_v17 = vpop.f32.mrf.mxu1 }
 0x153   : > { %v522_v18 = vpop.f32.mrf.mxu0  ;;  %v759_v19 = vmul.f32 %v758_v9, %v753_v12  ;;  %v752_v21 = vmax.f32 %v748_v15, 0.0  ;;  %v2832_v12 = vld [vmem:[#allocation8 + $0x2] ss:$0 sm:$0xff] }
 0x154   : > { %617 = vst [vmem:[#allocation2 + $0x31] sm:$0xff] %v600_v13  ;;  %v598_v20 = vmin.f32 %v582_v14, 6.0  ;;  %v523_v22 = vadd.f32 %v2749_v63, %v522_v18  ;;  %v585_v25 = vmax.f32 %v531_v16, 0.0  ;;  %v2771_v34 = vmul.f32 %v2763_v24, %v600_v13 }
 0x155   : > { %v1943_v26 = vpop.f32.mrf.mxu0  ;;  %761 = vst [vmem:[#allocation2 + $0x1] sm:$0xff] %v759_v19  ;;  %v754_v27 = vmin.f32 %v752_v21, 6.0  ;;  %v2774_v35 = vmul.f32 %v2761_v23, %v600_v13  ;;  %v970_v42 = vmul.f32 %v2766_v30, %v759_v19  ;;  %v974_v45 = vmul.f32 %v2766_v30, %v600_v13  ;;  %v2846_v21 = vld [vmem:[#allocation8 + $0x6] ss:$0 sm:$0xff] }
 0x156   : > { %615 = vst [vmem:[#allocation2 + $0x19] sm:$0xff] %v598_v20  ;;  %v583_v28 = vmax.f32 %v523_v22, 0.0  ;;  %v544_v29 = vadd.f32 %v1943_v26, %v2749_v63  ;;  %v601_v31 = vmin.f32 %v585_v25, 6.0  ;;  %v2781_v43 = vmul.f32 %v2761_v23, %v598_v20 }
 0x157   : > { %v535_v32 = vpop.f32.mrf.mxu0  ;;  %v760_v36 = vmul.f32 %v758_v9, %v754_v27  ;;  %v972_v44 = vmul.f32 %v2766_v30, %v598_v20 }
 0x158   : > { %v599_v37 = vmin.f32 %v583_v28, 6.0  ;;  %v588_v38 = vmax.f32 %v544_v29, 0.0  ;;  %v536_v39 = vadd.f32 %v2749_v63, %v535_v32  ;;  %618 = vst [vmem:[#allocation2 + $0x39] sm:$0xff] %v601_v31  ;;  %v2793_v51 = vmul.f32 %v2763_v24, %v601_v31 }
 0x159   : > { %v1944_v40 = vpop.f32.mrf.mxu0  ;;  %762 = vst [vmem:[#allocation2 + $0x9] sm:$0xff] %v760_v36  ;;  %v2796_v53 = vmul.f32 %v2766_v30, %v760_v36  ;;  %v2802_v56 = vmul.f32 %v2761_v23, %v601_v31  ;;  %v2805_v57 = vmul.f32 %v2766_v30, %v601_v31 }
 0x15a   : > { %616 = vst [vmem:[#allocation2 + $0x21] sm:$0xff] %v599_v37  ;;  %v2785_v46 = vmin.f32 %v588_v38, 6.0  ;;  %v586_v47 = vmax.f32 %v536_v39, 0.0  ;;  %v547_v48 = vadd.f32 %v1944_v40, %v2749_v63  ;;  %v2799_v54 = vmul.f32 %v2761_v23, %v599_v37 }
 0x15b   : > { %v538_v52 = vpop.f32.mrf.mxu0  ;;  %v1216_v55 = vld [vmem:[#allocation2 + $0x30] sm:$0xff]  ;;  %v2812_v61 = vmul.f32 %v2766_v30, %v599_v37 }
 0x15c   : > { %621 = vst [vmem:[#allocation2 + $0x61] sm:$0xff] %v2785_v46  ;;  %v2808_v58 = vmin.f32 %v586_v47, 6.0  ;;  %v589_v59 = vmax.f32 %v547_v48, 0.0  ;;  %v539_v60 = vadd.f32 %v2749_v63, %v538_v52  ;;  %v896_v0 = vld [vmem:[#allocation2] sm:$0xff]  ;;  %v2815_v2 = vmul.f32 %v2790_v50, %v1216_v55 }
 0x15d   : > { %v1947_v62 = vpop.f32.mrf.mxu0  ;;  %v1055_v1 = vld [vmem:[#allocation2 + $0x18] sm:$0xff]  ;;  %v2818_v3 = vmul.f32 %v2788_v49, %v1216_v55  ;;  %v921_v4 = vmul.f32 %v2777_v41, %v1216_v55  ;;  %v2823_v5 = vmul.f32 %v2763_v24, %v2785_v46  ;;  %v917_v9 = vmul.f32 %v2777_v41, %v896_v0 }
 0x15e   : > { %619 = vst [vmem:[#allocation2 + $0x49] sm:$0xff] %v2808_v58  ;;  %v2826_v6 = vmin.f32 %v589_v59, 6.0  ;;  %v587_v7 = vmax.f32 %v539_v60, 0.0  ;;  %v560_v8 = vadd.f32 %v1947_v62, %v2749_v63  ;;  %v1077_v13 = vmul.f32 %v2788_v49, %v1055_v1 }
 0x15f   : > { %v551_v11 = vpop.f32.mrf.mxu0  ;;  %v919_v14 = vmul.f32 %v2777_v41, %v1055_v1  ;;  %v2838_v15 = vmul.f32 %v2763_v24, %v2808_v58  ;;  %v2840_v16 = vadd.f32 %v974_v45, %v921_v4  ;;  %v986_v20 = vadd.f32 %v970_v42, %v917_v9  ;;  %v2848_v22 = vld [vmem:[#allocation2 + $0x38] sm:$0xff] }
 0x160   : > { %622 = vst [vmem:[#allocation2 + $0x69] sm:$0xff] %v2826_v6  ;;  %v2843_v17 = vmin.f32 %v587_v7, 6.0  ;;  %v592_v18 = vmax.f32 %v560_v8, 0.0  ;;  %v552_v19 = vadd.f32 %v2749_v63, %v551_v11  ;;  %v2850_v25 = vld [vmem:[#allocation2 + $0x32] sm:$0xff]  ;;  %v2852_v26 = vld [vmem:[#allocation2 + $0x3a] sm:$0xff]  ;;  %v897_v28 = vld [vmem:[#allocation2 + $0x8] sm:$0xff]  ;;  %v2856_v32 = vmul.f32 %v2790_v50, %v2848_v22 }
 0x161   : > { %v1948_v27 = vpop.f32.mrf.mxu0  ;;  %v1002_v29 = vld [vmem:[#allocation2 + $0x2] sm:$0xff]  ;;  %v1003_v31 = vld [vmem:[#allocation2 + $0xa] sm:$0xff]  ;;  %v2860_v36 = vmul.f32 %v2830_v10, %v2850_v25  ;;  %v2864_v37 = vmul.f32 %v2830_v10, %v2852_v26  ;;  %v988_v38 = vadd.f32 %v972_v44, %v919_v14  ;;  %v918_v45 = vmul.f32 %v2777_v41, %v897_v28  ;;  %v1162_v48 = vld [vmem:[#allocation2 + $0x1a] sm:$0xff] }
 0x162   : > { %620 = vst [vmem:[#allocation2 + $0x51] sm:$0xff] %v2843_v17  ;;  %v2867_v39 = vmin.f32 %v592_v18, 6.0  ;;  %v590_v40 = vmax.f32 %v552_v19, 0.0  ;;  %v563_v42 = vadd.f32 %v1948_v27, %v2749_v63  ;;  %v1056_v47 = vld [vmem:[#allocation2 + $0x20] sm:$0xff]  ;;  %v1023_v59 = vmul.f32 %v2832_v12, %v1002_v29 }
 0x163   : > { %v1163_v52 = vld [vmem:[#allocation2 + $0x22] sm:$0xff]  ;;  %v554_v55 = vpop.f32.mrf.mxu0  ;;  %v1024_v60 = vmul.f32 %v2832_v12, %v1003_v31  ;;  %v1078_v62 = vmul.f32 %v2788_v49, %v1056_v47  ;;  %v1183_v44 = vmul.f32 %v2846_v21, %v1162_v48  ;;  %v987_v7 = vadd.f32 %v2796_v53, %v918_v45 }
 0x164   : > { %625 = vst [vmem:[#allocation2 + $0x91] sm:$0xff] %v2867_v39  ;;  %v2876_v0 = vmin.f32 %v590_v40, 6.0  ;;  %v593_v1 = vmax.f32 %v563_v42, 0.0  ;;  %v555_v4 = vadd.f32 %v2749_v63, %v554_v55  ;;  %v1039_v9 = vadd.f32 %v1023_v59, %v986_v20 }
 0x165   : > { %v1951_v8 = vpop.f32.mrf.mxu0  ;;  %v1184_v11 = vmul.f32 %v2846_v21, %v1163_v52  ;;  %v920_v14 = vmul.f32 %v2777_v41, %v1056_v47  ;;  %v1025_v18 = vmul.f32 %v2832_v12, %v1162_v48  ;;  %v1040_v29 = vadd.f32 %v1024_v60, %v987_v7 }
 0x166   : > { %623 = vst [vmem:[#allocation2 + $0x79] sm:$0xff] %v2876_v0  ;;  %v2884_v19 = vmin.f32 %v593_v1, 6.0  ;;  %v591_v27 = vmax.f32 %v555_v4, 0.0  ;;  %v576_v28 = vadd.f32 %v1951_v8, %v2749_v63  ;;  %v1093_v40 = vadd.f32 %v1077_v13, %v1039_v9 }
 0x167   : > { %v567_v31 = vpop.f32.mrf.mxu0  ;;  %v989_v53 = vadd.f32 %v2812_v61, %v920_v14  ;;  %v1026_v20 = vmul.f32 %v2832_v12, %v1163_v52  ;;  %v1041_v42 = vadd.f32 %v1025_v18, %v988_v38  ;;  %v1094_v55 = vadd.f32 %v1078_v62, %v1040_v29  ;;  %v2909_v29 = vld [vmem:[#allocation2 + $0x48] sm:$0xff] }
 0x168   : > { %626 = vst [vmem:[#allocation2 + $0x99] sm:$0xff] %v2884_v19  ;;  %v2890_v45 = vmin.f32 %v591_v27, 6.0  ;;  %v596_v47 = vmax.f32 %v576_v28, 0.0  ;;  %v568_v48 = vadd.f32 %v2749_v63, %v567_v31  ;;  %v1146_v1 = vadd.f32 %v2781_v43, %v1093_v40 }
 0x169   : > { %v1952_v59 = vpop.f32.mrf.mxu0  ;;  %v1042_v4 = vadd.f32 %v1026_v20, %v989_v53  ;;  %v1080_v13 = vmul.f32 %v2788_v49, %v2848_v22  ;;  %v1095_v61 = vadd.f32 %v2818_v3, %v1041_v42  ;;  %v1147_v7 = vadd.f32 %v2799_v54, %v1094_v55  ;;  %v2911_v31 = vld [vmem:[#allocation2 + $0x50] sm:$0xff] }
 0x16a   : > { %624 = vst [vmem:[#allocation2 + $0x81] sm:$0xff] %v2890_v45  ;;  %v2898_v38 = vmin.f32 %v596_v47, 6.0  ;;  %v594_v52 = vmax.f32 %v568_v48, 0.0  ;;  %v579_v60 = vadd.f32 %v1952_v59, %v2749_v63  ;;  %v1199_v62 = vadd.f32 %v1183_v44, %v1146_v1  ;;  %v2922_v48 = vld [vmem:[#allocation2 + $0x4a] sm:$0xff] }
 0x16b   : > { %v570_v8 = vpop.f32.mrf.mxu0  ;;  %v1096_v9 = vadd.f32 %v1080_v13, %v1042_v4  ;;  %v1148_v43 = vadd.f32 %v2774_v35, %v1095_v61  ;;  %v1185_v14 = vmul.f32 %v2846_v21, %v2850_v25  ;;  %v1200_v28 = vadd.f32 %v1184_v11, %v1147_v7  ;;  %v2929_v4 = vld [vmem:[#allocation2 + $0x52] sm:$0xff] }
 0x16c   : > { %629 = vst [vmem:[#allocation2 + $0xc1] sm:$0xff] %v2898_v38  ;;  %v2906_v3 = vmin.f32 %v594_v52, 6.0  ;;  %v597_v18 = vmax.f32 %v579_v60, 0.0  ;;  %v571_v27 = vadd.f32 %v2749_v63, %v570_v8  ;;  %v1254_v44 = vadd.f32 %v2815_v2, %v1199_v62 }
 0x16d   : > { %v876_v54 = vpop.f32.mrf.mxu0  ;;  %v1149_v35 = vadd.f32 %v2802_v56, %v1096_v9  ;;  %v1186_v40 = vmul.f32 %v2846_v21, %v2852_v26  ;;  %v1201_v53 = vadd.f32 %v1185_v14, %v1148_v43  ;;  %v1255_v47 = vadd.f32 %v2856_v32, %v1200_v28 }
 0x16e   : > { %627 = vst [vmem:[#allocation2 + $0xa9] sm:$0xff] %v2906_v3  ;;  %v2918_v20 = vmin.f32 %v597_v18, 6.0  ;;  %v595_v42 = vmax.f32 %v571_v27, 0.0  ;;  %v877_v11 = vadd.f32 %v2749_v63, %v876_v54  ;;  %v1307_v2 = vadd.f32 %v2771_v34, %v1254_v44  ;;  %v2938_v34 = vld [vmem:[%s3304_s4] ss:$0 sm:$0xff] }
 0x16f   : > { %v1991_v55 = vpop.f32.mrf.mxu0  ;;  %v1202_v59 = vadd.f32 %v1186_v40, %v1149_v35  ;;  %v1240_v56 = vmul.f32 %v2790_v50, %v2909_v29  ;;  %v1241_v1 = vmul.f32 %v2790_v50, %v2911_v31  ;;  %v1308_v32 = vadd.f32 %v2793_v51, %v1255_v47 }
 0x170   : > { %630 = vst [vmem:[#allocation2 + $0xc9] sm:$0xff] %v2918_v20  ;;  %v2932_v13 = vmin.f32 %v595_v42, 6.0  ;;  %v883_v61 = vmax.f32 %v877_v11, 0.0  ;;  %v1294_v52 = vmul.f32 %v2763_v24, %v2843_v17  ;;  %v1360_v7 = vadd.f32 %v2860_v36, %v1307_v2 }
 0x171   : > { %v879_v60 = vpop.f32.mrf.mxu0  ;;  %v1256_v8 = vadd.f32 %v1240_v56, %v1201_v53  ;;  %v1257_v62 = vadd.f32 %v1241_v1, %v1202_v59  ;;  %v1346_v9 = vmul.f32 %v2830_v10, %v2922_v48  ;;  %v1361_v14 = vadd.f32 %v2864_v37, %v1308_v32 }
 0x172   : > { %628 = vst [vmem:[#allocation2 + $0xb1] sm:$0xff] %v2932_v13  ;;  %v885_v43 = vmin.f32 %v883_v61, 6.0  ;;  %v880_v51 = vadd.f32 %v2749_v63, %v879_v60  ;;  %v1347_v18 = vmul.f32 %v2830_v10, %v2929_v4  ;;  %v1383_v28 = vadd.f32 %v2938_v34, %v1360_v7 }
 0x173   : > { %v1992_v27 = vpop.f32.mrf.mxu0  ;;  %v1309_v36 = vadd.f32 %v2838_v15, %v1256_v8  ;;  %v1310_v54 = vadd.f32 %v1294_v52, %v1257_v62  ;;  %v922_v44 = vmul.f32 %v2777_v41, %v2848_v22  ;;  %v1384_v63 = vadd.f32 %v2938_v34, %v1361_v14  ;;  %v1220_v8 = vld [vmem:[#allocation2 + $0x60] sm:$0xff]  ;;  %v1221_v62 = vld [vmem:[#allocation2 + $0x68] sm:$0xff] }
 0x174   : > { %v2955_v35 = vmul.f32 %v2768_v33, %v885_v43  ;;  %v884_v40 = vmax.f32 %v880_v51, 0.0  ;;  %v1027_v37 = vmul.f32 %v2832_v12, %v2850_v25  ;;  %v1399_v53 = vmax.f32 %v1383_v28, 0.0  ;;  %v1327_v14 = vld [vmem:[#allocation2 + $0x62] sm:$0xff] }
 0x175   : > { %v1362_v42 = vadd.f32 %v1346_v9, %v1309_v36  ;;  %v1363_v11 = vadd.f32 %v1347_v18, %v1310_v54  ;;  %v991_v47 = vadd.f32 %v2805_v57, %v922_v44  ;;  %v1400_v55 = vmax.f32 %v1384_v63, 0.0 }
 0x176   : > { %894 = vst [vmem:[#allocation2 + $0xd9] sm:$0xff] %v2955_v35  ;;  %v886_v15 = vmin.f32 %v884_v40, 6.0  ;;  %v1028_v22 = vmul.f32 %v2832_v12, %v2852_v26  ;;  %v1043_v2 = vadd.f32 %v1027_v37, %v2840_v16  ;;  %v1415_v59 = vmin.f32 %v1399_v53, 6.0  ;;  %v1328_v37 = vld [vmem:[#allocation2 + $0x6a] sm:$0xff] }
 0x177   : > { %v1385_v56 = vadd.f32 %v2938_v34, %v1362_v42  ;;  %v1386_v1 = vadd.f32 %v2938_v34, %v1363_v11  ;;  %v1081_v25 = vmul.f32 %v2788_v49, %v2909_v29  ;;  %v1416_v57 = vmin.f32 %v1400_v55, 6.0 }
 0x178   : > { %v2970_v61 = vmul.f32 %v2768_v33, %v886_v15  ;;  %v1044_v32 = vadd.f32 %v1028_v22, %v991_v47  ;;  %v1082_v52 = vmul.f32 %v2788_v49, %v2911_v31  ;;  %v1134_v16 = vmul.f32 %v2761_v23, %v2808_v58 }
 0x179   : > { %v1401_v60 = vmax.f32 %v1385_v56, 0.0  ;;  %v1402_v26 = vmax.f32 %v1386_v1, 0.0  ;;  %v1097_v7 = vadd.f32 %v1081_v25, %v1043_v2  ;;  %v1431_v9 = vpack.c.bf16 %v1416_v57, %v1415_v59 }
 0x17a   : > { %895 = vst [vmem:[#allocation2 + $0xe1] sm:$0xff] %v2970_v61  ;;  %v1098_v43 = vadd.f32 %v1082_v52, %v1044_v32  ;;  %v1135_v33 = vmul.f32 %v2761_v23, %v2843_v17  ;;  %v1187_v51 = vmul.f32 %v2846_v21, %v2922_v48  ;;  %v1136_v36 = vmul.f32 %v2761_v23, %v2785_v46  ;;  %v3004_v52 = vld [vmem:[#allocation2 + $0x78] sm:$0xff] }
 0x17b   : > { %v1417_v18 = vmin.f32 %v1401_v60, 6.0  ;;  %v1418_v27 = vmin.f32 %v1402_v26, 6.0  ;;  %v1150_v28 = vadd.f32 %v1134_v16, %v1097_v7  ;;  %2009 = vmatprep.mubr.bf16.mxu1 %v1431_v9  ;;  %v1188_v44 = vmul.f32 %v2846_v21, %v2929_v4 }
 0x17c   : > { %v1151_v54 = vadd.f32 %v1135_v33, %v1098_v43  ;;  %v1242_v40 = vmul.f32 %v2790_v50, %v1220_v8  ;;  %v1243_v63 = vmul.f32 %v2790_v50, %v1221_v62  ;;  %v1296_v11 = vmul.f32 %v2763_v24, %v2826_v6  ;;  %v3014_v43 = vld [vmem:[#allocation2 + $0x7a] sm:$0xff] }
 0x17d   : > { %v1432_v53 = vpack.c.bf16 %v1418_v27, %v1417_v18  ;;  %v1203_v42 = vadd.f32 %v1187_v51, %v1150_v28  ;;  %v1348_v47 = vmul.f32 %v2830_v10, %v1327_v14  ;;  %v923_v55 = vmul.f32 %v2777_v41, %v2909_v29 }
 0x17e   : > { %v1204_v15 = vadd.f32 %v1188_v44, %v1151_v54  ;;  %v924_v22 = vmul.f32 %v2777_v41, %v2911_v31  ;;  %v976_v2 = vmul.f32 %v2766_v30, %v2808_v58  ;;  %v1349_v56 = vmul.f32 %v2830_v10, %v1328_v37  ;;  %v3006_v58 = vld [vmem:[#allocation2 + $0x80] sm:$0xff] }
 0x17f   : > { %2010 = vmatmul.mubr.bf16.vlgmr.msra.gmra.mxu1 %v1432_v53  ;;  %v1258_v59 = vadd.f32 %v1242_v40, %v1203_v42  ;;  %v977_v1 = vmul.f32 %v2766_v30, %v2843_v17  ;;  %v1029_v25 = vmul.f32 %v2832_v12, %v2922_v48  ;;  %v1030_v29 = vmul.f32 %v2832_v12, %v2929_v4 }
 0x180   : > { %v1259_v57 = vadd.f32 %v1243_v63, %v1204_v15  ;;  %v992_v32 = vadd.f32 %v976_v2, %v923_v55  ;;  %v1083_v31 = vmul.f32 %v2788_v49, %v1220_v8  ;;  %v1084_v7 = vmul.f32 %v2788_v49, %v1221_v62 }
 0x181   : > { %v1311_v60 = vadd.f32 %v2823_v5, %v1258_v59  ;;  %v993_v26 = vadd.f32 %v977_v1, %v924_v22  ;;  %v1137_v17 = vmul.f32 %v2761_v23, %v2826_v6  ;;  %v1189_v9 = vmul.f32 %v2846_v21, %v1327_v14 }
 0x182   : > { %v1312_v48 = vadd.f32 %v1296_v11, %v1259_v57  ;;  %v1045_v16 = vadd.f32 %v1029_v25, %v992_v32  ;;  %v1190_v4 = vmul.f32 %v2846_v21, %v1328_v37  ;;  %v1244_v18 = vmul.f32 %v2790_v50, %v3004_v52  ;;  %v1330_v57 = vld [vmem:[#allocation2 + $0x82] sm:$0xff] }
 0x183   : > { %v1364_v33 = vadd.f32 %v1348_v47, %v1311_v60  ;;  %v1046_v51 = vadd.f32 %v1030_v29, %v993_v26  ;;  %v1245_v5 = vmul.f32 %v2790_v50, %v3006_v58  ;;  %v1297_v54 = vmul.f32 %v2763_v24, %v2876_v0 }
 0x184   : > { %v1365_v27 = vadd.f32 %v1349_v56, %v1312_v48  ;;  %v1099_v28 = vadd.f32 %v1083_v31, %v1045_v16  ;;  %v1298_v44 = vmul.f32 %v2763_v24, %v2890_v45  ;;  %v1350_v53 = vmul.f32 %v2830_v10, %v3014_v43  ;;  %v3045_v16 = vld [vmem:[#allocation2 + $0x98] sm:$0xff] }
 0x185   : > { %v1387_v40 = vadd.f32 %v2938_v34, %v1364_v33  ;;  %v1100_v63 = vadd.f32 %v1084_v7, %v1046_v51  ;;  %v925_v42 = vmul.f32 %v2777_v41, %v1220_v8  ;;  %v926_v15 = vmul.f32 %v2777_v41, %v1221_v62 }
 0x186   : > { %v1388_v11 = vadd.f32 %v2938_v34, %v1365_v27  ;;  %v1152_v47 = vadd.f32 %v1136_v36, %v1099_v28  ;;  %v978_v55 = vmul.f32 %v2766_v30, %v2785_v46  ;;  %v979_v59 = vmul.f32 %v2766_v30, %v2826_v6 }
 0x187   : > { %v1403_v22 = vmax.f32 %v1387_v40, 0.0  ;;  %v1153_v2 = vadd.f32 %v1137_v17, %v1100_v63  ;;  %v1031_v56 = vmul.f32 %v2832_v12, %v1327_v14  ;;  %v1032_v8 = vmul.f32 %v2832_v12, %v1328_v37  ;;  %v3043_v37 = vld [vmem:[#allocation2 + $0x90] sm:$0xff] }
 0x188   : > { %v1404_v1 = vmax.f32 %v1388_v11, 0.0  ;;  %v1205_v25 = vadd.f32 %v1189_v9, %v1152_v47  ;;  %v994_v32 = vadd.f32 %v978_v55, %v925_v42  ;;  %v995_v31 = vadd.f32 %v979_v59, %v926_v15  ;;  %v3052_v40 = vld [vmem:[#allocation2 + $0x92] sm:$0xff]  ;;  %v1332_v59 = vld [vmem:[#allocation2 + $0x9a] sm:$0xff] }
 0x189   : > { %v1419_v29 = vmin.f32 %v1403_v22, 6.0  ;;  %v1206_v36 = vadd.f32 %v1190_v4, %v1153_v2  ;;  %v1085_v62 = vmul.f32 %v2788_v49, %v3004_v52  ;;  %v1086_v6 = vmul.f32 %v2788_v49, %v3006_v58 }
 0x18a   : > { %v1420_v46 = vmin.f32 %v1404_v1, 6.0  ;;  %v1260_v60 = vadd.f32 %v1244_v18, %v1205_v25  ;;  %v1047_v26 = vadd.f32 %v1031_v56, %v994_v32  ;;  %v1351_v14 = vmul.f32 %v2830_v10, %v1330_v57 }
 0x18b   : > { %v1261_v7 = vadd.f32 %v1245_v5, %v1206_v36  ;;  %v1048_v17 = vadd.f32 %v1032_v8, %v995_v31  ;;  %v1138_v48 = vmul.f32 %v2761_v23, %v2876_v0  ;;  %v1191_v51 = vmul.f32 %v2846_v21, %v3014_v43 }
 0x18c   : > { %v1433_v9 = vpack.c.bf16 %v1420_v46, %v1419_v29  ;;  %v1313_v4 = vadd.f32 %v1297_v54, %v1260_v60  ;;  %v1101_v33 = vadd.f32 %v1085_v62, %v1047_v26  ;;  %v1139_v5 = vmul.f32 %v2761_v23, %v2890_v45 }
 0x18d   : > { %v1314_v18 = vadd.f32 %v1298_v44, %v1261_v7  ;;  %v1102_v27 = vadd.f32 %v1086_v6, %v1048_v17  ;;  %v1192_v28 = vmul.f32 %v2846_v21, %v1330_v57  ;;  %v1246_v11 = vmul.f32 %v2790_v50, %v3043_v37 }
 0x18e   : > { %2013 = vmatprep.mubr.bf16.mxu1 %v1433_v9  ;;  %v1366_v63 = vadd.f32 %v1350_v53, %v1313_v4  ;;  %v1154_v42 = vadd.f32 %v1138_v48, %v1101_v33  ;;  %v1247_v54 = vmul.f32 %v2790_v50, %v3045_v16  ;;  %v1299_v44 = vmul.f32 %v2763_v24, %v2867_v39 }
 0x18f   : > { %v1367_v47 = vadd.f32 %v1351_v14, %v1314_v18  ;;  %v1155_v15 = vadd.f32 %v1139_v5, %v1102_v27  ;;  %v1300_v55 = vmul.f32 %v2763_v24, %v2884_v19  ;;  %v1352_v53 = vmul.f32 %v2830_v10, %v3052_v40  ;;  %v3086_v18 = vld [vmem:[#allocation2 + $0xb0] sm:$0xff] }
 0x190   : > { %v1389_v22 = vadd.f32 %v2938_v34, %v1366_v63  ;;  %v1207_v2 = vadd.f32 %v1191_v51, %v1154_v42  ;;  %v927_v56 = vmul.f32 %v2777_v41, %v3004_v52  ;;  %v928_v32 = vmul.f32 %v2777_v41, %v3006_v58  ;;  %v3084_v51 = vld [vmem:[#allocation2 + $0xa8] sm:$0xff] }
 0x191   : > { %v1390_v1 = vadd.f32 %v2938_v34, %v1367_v47  ;;  %v1208_v25 = vadd.f32 %v1192_v28, %v1155_v15  ;;  %v980_v8 = vmul.f32 %v2766_v30, %v2876_v0  ;;  %v981_v31 = vmul.f32 %v2766_v30, %v2890_v45  ;;  %v3094_v47 = vld [vmem:[#allocation2 + $0xaa] sm:$0xff] }
 0x192   : > { %v1405_v29 = vmax.f32 %v1389_v22, 0.0  ;;  %v1262_v36 = vadd.f32 %v1246_v11, %v1207_v2  ;;  %v1033_v62 = vmul.f32 %v2832_v12, %v3014_v43  ;;  %v1353_v52 = vmul.f32 %v2830_v10, %v1332_v59 }
 0x193   : > { %v1406_v46 = vmax.f32 %v1390_v1, 0.0  ;;  %v1263_v60 = vadd.f32 %v1247_v54, %v1208_v25  ;;  %v996_v26 = vadd.f32 %v980_v8, %v927_v56  ;;  %v997_v14 = vadd.f32 %v981_v31, %v928_v32 }
 0x194   : > { %v1421_v6 = vmin.f32 %v1405_v29, 6.0  ;;  %v1315_v7 = vadd.f32 %v1299_v44, %v1262_v36  ;;  %v1034_v58 = vmul.f32 %v2832_v12, %v1330_v57  ;;  %v1087_v9 = vmul.f32 %v2788_v49, %v3043_v37 }
 0x195   : > { %v1422_v17 = vmin.f32 %v1406_v46, 6.0  ;;  %v1316_v0 = vadd.f32 %v1300_v55, %v1263_v60  ;;  %v1049_v48 = vadd.f32 %v1033_v62, %v996_v26  ;;  %v1088_v43 = vmul.f32 %v2788_v49, %v3045_v16  ;;  %v1334_v26 = vld [vmem:[#allocation2 + $0xb2] sm:$0xff] }
 0x196   : > { %v1368_v45 = vadd.f32 %v1352_v53, %v1315_v7  ;;  %v1050_v4 = vadd.f32 %v1034_v58, %v997_v14  ;;  %v1140_v33 = vmul.f32 %v2761_v23, %v2867_v39  ;;  %v1141_v28 = vmul.f32 %v2761_v23, %v2884_v19 }
 0x197   : > { %v1434_v27 = vpack.c.bf16 %v1422_v17, %v1421_v6  ;;  %v1369_v57 = vadd.f32 %v1353_v52, %v1316_v0  ;;  %v1103_v5 = vadd.f32 %v1087_v9, %v1049_v48  ;;  %v1193_v11 = vmul.f32 %v2846_v21, %v3052_v40 }
 0x198   : > { %v1391_v63 = vadd.f32 %v2938_v34, %v1368_v45  ;;  %v1104_v42 = vadd.f32 %v1088_v43, %v1050_v4  ;;  %v1194_v54 = vmul.f32 %v2846_v21, %v1332_v59  ;;  %v1248_v55 = vmul.f32 %v2790_v50, %v3084_v51  ;;  %v1228_v4 = vld [vmem:[#allocation2 + $0xc0] sm:$0xff]  ;;  %v1229_v43 = vld [vmem:[#allocation2 + $0xc8] sm:$0xff] }
 0x199   : > { %2014 = vmatmul.mubr.bf16.gmra.mxu1 %v1434_v27  ;;  %v1392_v15 = vadd.f32 %v2938_v34, %v1369_v57  ;;  %v1156_v44 = vadd.f32 %v1140_v33, %v1103_v5  ;;  %v1249_v22 = vmul.f32 %v2790_v50, %v3086_v18  ;;  %v1301_v56 = vmul.f32 %v2763_v24, %v2906_v3 }
 0x19a   : > { %v1407_v2 = vmax.f32 %v1391_v63, 0.0  ;;  %v1157_v53 = vadd.f32 %v1141_v28, %v1104_v42  ;;  %v1302_v1 = vmul.f32 %v2763_v24, %v2932_v13  ;;  %v1354_v8 = vmul.f32 %v2830_v10, %v3094_v47 }
 0x19b   : > { %v1408_v25 = vmax.f32 %v1392_v15, 0.0  ;;  %v1209_v32 = vadd.f32 %v1193_v11, %v1156_v44  ;;  %v929_v29 = vmul.f32 %v2777_v41, %v3043_v37  ;;  %v930_v62 = vmul.f32 %v2777_v41, %v3045_v16 }
 0x19c   : > { %v1423_v36 = vmin.f32 %v1407_v2, 6.0  ;;  %v1210_v31 = vadd.f32 %v1194_v54, %v1157_v53  ;;  %v982_v46 = vmul.f32 %v2766_v30, %v2867_v39  ;;  %v983_v6 = vmul.f32 %v2766_v30, %v2884_v19 }
 0x19d   : > { %v1424_v60 = vmin.f32 %v1408_v25, 6.0  ;;  %v1264_v52 = vadd.f32 %v1248_v55, %v1209_v32  ;;  %v1035_v7 = vmul.f32 %v2832_v12, %v3052_v40  ;;  %v1036_v37 = vmul.f32 %v2832_v12, %v1332_v59 }
 0x19e   : > { %v1265_v14 = vadd.f32 %v1249_v22, %v1210_v31  ;;  %v998_v58 = vadd.f32 %v982_v46, %v929_v29  ;;  %v1089_v17 = vmul.f32 %v2788_v49, %v3084_v51  ;;  %v999_v48 = vadd.f32 %v983_v6, %v930_v62  ;;  %v1335_v29 = vld [vmem:[#allocation2 + $0xc2] sm:$0xff]  ;;  %v1336_v6 = vld [vmem:[#allocation2 + $0xca] sm:$0xff] }
 0x19f   : > { %v1435_v16 = vpack.c.bf16 %v1424_v60, %v1423_v36  ;;  %v1317_v0 = vadd.f32 %v1301_v56, %v1264_v52  ;;  %v1090_v39 = vmul.f32 %v2788_v49, %v3086_v18  ;;  %v1355_v45 = vmul.f32 %v2830_v10, %v1334_v26 }
 0x1a0   : > { %v1318_v9 = vadd.f32 %v1302_v1, %v1265_v14  ;;  %v1051_v19 = vadd.f32 %v1035_v7, %v998_v58  ;;  %v1052_v33 = vadd.f32 %v1036_v37, %v999_v48  ;;  %v1142_v59 = vmul.f32 %v2761_v23, %v2906_v3  ;;  %v1123_v7 = vld [vmem:[#allocation2 + $0xc1] sm:$0xff] }
 0x1a1   : > { %2017 = vmatprep.mubr.bf16.mxu1 %v1435_v16  ;;  %v1370_v40 = vadd.f32 %v1354_v8, %v1317_v0  ;;  %v1143_v27 = vmul.f32 %v2761_v23, %v2932_v13  ;;  %v1195_v28 = vmul.f32 %v2846_v21, %v3094_v47  ;;  %v1196_v63 = vmul.f32 %v2846_v21, %v1334_v26 }
 0x1a2   : > { %v1371_v57 = vadd.f32 %v1355_v45, %v1318_v9  ;;  %v1105_v5 = vadd.f32 %v1089_v17, %v1051_v19  ;;  %v1106_v11 = vadd.f32 %v1090_v39, %v1052_v33  ;;  %v1250_v54 = vmul.f32 %v2790_v50, %v1228_v4  ;;  %v1230_v45 = vld [vmem:[#allocation2 + $0xd8] sm:$0xff] }
 0x1a3   : > { %v1393_v42 = vadd.f32 %v2938_v34, %v1370_v40  ;;  %v1251_v15 = vmul.f32 %v2790_v50, %v1229_v43  ;;  %v1303_v22 = vmul.f32 %v2763_v24, %v2898_v38  ;;  %v1304_v2 = vmul.f32 %v2763_v24, %v2918_v20 }
 0x1a4   : > { %v1394_v44 = vadd.f32 %v2938_v34, %v1371_v57  ;;  %v1158_v55 = vadd.f32 %v1142_v59, %v1105_v5  ;;  %v1159_v56 = vadd.f32 %v1143_v27, %v1106_v11  ;;  %v931_v1 = vmul.f32 %v2777_v41, %v3084_v51  ;;  %v1338_v11 = vld [vmem:[#allocation2 + $0xe2] sm:$0xff] }
 0x1a5   : > { %v1409_v53 = vmax.f32 %v1393_v42, 0.0  ;;  %v932_v25 = vmul.f32 %v2777_v41, %v3086_v18  ;;  %v984_v36 = vmul.f32 %v2766_v30, %v2906_v3  ;;  %v985_v38 = vmul.f32 %v2766_v30, %v2932_v13  ;;  %v1337_v42 = vld [vmem:[#allocation2 + $0xda] sm:$0xff] }
 0x1a6   : > { %v1410_v32 = vmax.f32 %v1394_v44, 0.0  ;;  %v1211_v8 = vadd.f32 %v1195_v28, %v1158_v55  ;;  %v1212_v62 = vadd.f32 %v1196_v63, %v1159_v56  ;;  %v1037_v46 = vmul.f32 %v2832_v12, %v3094_v47 }
 0x1a7   : > { %v1425_v31 = vmin.f32 %v1409_v53, 6.0  ;;  %v1038_v60 = vmul.f32 %v2832_v12, %v1334_v26  ;;  %v1000_v41 = vadd.f32 %v984_v36, %v931_v1  ;;  %v1001_v18 = vadd.f32 %v985_v38, %v932_v25 }
 0x1a8   : > { %v1426_v51 = vmin.f32 %v1410_v32, 6.0  ;;  %v1266_v52 = vadd.f32 %v1250_v54, %v1211_v8  ;;  %v1267_v14 = vadd.f32 %v1251_v15, %v1212_v62  ;;  %v1356_v58 = vmul.f32 %v2830_v10, %v1335_v29  ;;  %v1609_v62 = vld [vmem:[%s2709_s16 + $0x10] sm:$0xff] }
 0x1a9   : > { %v1091_v3 = vmul.f32 %v2788_v49, %v1228_v4  ;;  %v1092_v30 = vmul.f32 %v2788_v49, %v1229_v43  ;;  %v1053_v17 = vadd.f32 %v1037_v46, %v1000_v41  ;;  %v1054_v16 = vadd.f32 %v1038_v60, %v1001_v18  ;;  %v1231_v4 = vld [vmem:[#allocation2 + $0xe0] sm:$0xff]  ;;  %v1610_v41 = vld [vmem:[%s2709_s16 + $0x18] sm:$0xff] }
 0x1aa   : > { %v1436_v13 = vpack.c.bf16 %v1426_v51, %v1425_v31  ;;  %v1319_v37 = vadd.f32 %v1303_v22, %v1266_v52  ;;  %v1320_v47 = vadd.f32 %v1304_v2, %v1267_v14  ;;  %v1357_v12 = vmul.f32 %v2830_v10, %v1336_v6  ;;  %v1607_v60 = vld [vmem:[%s2709_s16] sm:$0xff] }
 0x1ab   : > { %v1144_v26 = vmul.f32 %v2761_v23, %v1123_v7  ;;  %v1107_v48 = vadd.f32 %v1091_v3, %v1053_v17  ;;  %v1108_v39 = vadd.f32 %v1092_v30, %v1054_v16  ;;  %v1145_v9 = vmul.f32 %v2761_v23, %v2918_v20  ;;  %v1613_v17 = vld [vmem:[%s2709_s16 + $0x30] sm:$0xff] }
 0x1ac   : > { %2018 = vmatmul.mubr.bf16.gmra.mxu1 %v1436_v13  ;;  %v1372_v0 = vadd.f32 %v1356_v58, %v1319_v37  ;;  %v1373_v19 = vadd.f32 %v1357_v12, %v1320_v47  ;;  %v1197_v49 = vmul.f32 %v2846_v21, %v1335_v29  ;;  %v1198_v59 = vmul.f32 %v2846_v21, %v1336_v6  ;;  %v1608_v58 = vld [vmem:[%s2709_s16 + $0x8] sm:$0xff]  ;;  %v1611_v12 = vld [vmem:[%s2709_s16 + $0x20] sm:$0xff] }
 0x1ad   : > { %v1160_v40 = vadd.f32 %v1144_v26, %v1107_v48  ;;  %v1161_v33 = vadd.f32 %v1145_v9, %v1108_v39  ;;  %v1252_v57 = vmul.f32 %v2790_v50, %v1230_v45  ;;  %v1253_v23 = vmul.f32 %v2790_v50, %v1231_v4  ;;  %v1614_v39 = vld [vmem:[%s2709_s16 + $0x38] sm:$0xff] }
 0x1ae   : > { %v1395_v43 = vadd.f32 %v2938_v34, %v1372_v0  ;;  %v1396_v27 = vadd.f32 %v2938_v34, %v1373_v19  ;;  %v1305_v44 = vmul.f32 %v2763_v24, %v2955_v35  ;;  %v1306_v21 = vmul.f32 %v2763_v24, %v2970_v61 }
 0x1af   : > { %v1213_v28 = vadd.f32 %v1197_v49, %v1160_v40  ;;  %v1214_v63 = vadd.f32 %v1198_v59, %v1161_v33  ;;  %v1358_v56 = vmul.f32 %v2830_v10, %v1337_v42  ;;  %v1359_v50 = vmul.f32 %v2830_v10, %v1338_v11  ;;  %v3174_v10 = vld [vmem:[%s3306_s6] ss:$0 sm:$0xff]  ;;  %v1612_v49 = vld [vmem:[%s2709_s16 + $0x28] sm:$0xff]  ;;  %v1617_v59 = vld [vmem:[%s2709_s16 + $0x50] sm:$0xff] }
 0x1b0   : > { %v1411_v5 = vmax.f32 %v1395_v43, 0.0  ;;  %v1412_v20 = vmax.f32 %v1396_v27, 0.0 }
 0x1b1   : > { %v1268_v54 = vadd.f32 %v1252_v57, %v1213_v28  ;;  %v1269_v15 = vadd.f32 %v1253_v23, %v1214_v63 }
 0x1b2   : > { %v1427_v55 = vmin.f32 %v1411_v5, 6.0  ;;  %v1428_v22 = vmin.f32 %v1412_v20, 6.0  ;;  %v1615_v5 = vld [vmem:[%s2709_s16 + $0x40] sm:$0xff]  ;;  %v1618_v20 = vld [vmem:[%s2709_s16 + $0x58] sm:$0xff] }
 0x1b3   : > { %v1321_v2 = vadd.f32 %v1305_v44, %v1268_v54  ;;  %v1322_v53 = vadd.f32 %v1306_v21, %v1269_v15  ;;  %v1616_v15 = vld [vmem:[%s2709_s16 + $0x48] sm:$0xff] }
 0x1b4   : > { %v1437_v1 = vpack.c.bf16 %v1428_v22, %v1427_v55 }
 0x1b5   : > { %v1374_v25 = vadd.f32 %v1358_v56, %v1321_v2  ;;  %v1375_v32 = vadd.f32 %v1359_v50, %v1322_v53  ;;  %v1621_v2 = vld [vmem:[%s2709_s16 + $0x70] sm:$0xff]  ;;  %v1619_v50 = vld [vmem:[%s2709_s16 + $0x60] sm:$0xff] }
 0x1b6   : > { %2021 = vmatprep.mubr.bf16.mxu1 %v1437_v1 }
 0x1b7   : > { %v1397_v35 = vadd.f32 %v2938_v34, %v1374_v25  ;;  %v1398_v24 = vadd.f32 %v2938_v34, %v1375_v32 }
 0x1b9   : > { %v1413_v61 = vmax.f32 %v1397_v35, 0.0  ;;  %v1414_v8 = vmax.f32 %v1398_v24, 0.0  ;;  %v1622_v35 = vld [vmem:[%s2709_s16 + $0x78] sm:$0xff] }
 0x1bb   : > { %v1429_v29 = vmin.f32 %v1413_v61, 6.0  ;;  %v1430_v36 = vmin.f32 %v1414_v8, 6.0 }
 0x1bd   : > { %v1438_v38 = vpack.c.bf16 %v1430_v36, %v1429_v29  ;;  %v1620_v29 = vld [vmem:[%s2709_s16 + $0x68] sm:$0xff]  ;;  %s2304_s16 = scalar_lea.vmem %s3234_s5, 2048 }
 0x1be   : > { %p2305_p9 = scmp.ne.s32.totalorder %s3234_s5, %s2304_s16  ;;  %p2312_p7 = scmp.lt.s32.totalorder %s2310_s9, %s2304_s16 }
 0x1bf   : > { %2022 = vmatmul.mubr.bf16.gmra.mxu1 %v1438_v38 }
 0x1c0   : > { %p2306_p2 = pnand %p2305_p9, %p3348_p12  ;;  %p2313_p0 = por %p2312_p7, %p2311_p3 }
 0x1c2   : > { %p2307_p1 = pneg %p2306_p2 }
 0x1c4   : > { %p2314_p4 = pnand %p2313_p0, %p2307_p1 }
 0x23f   : > { %v2011_v31 = vpop.f32.mrf.mxu1 }
 0x240   : > { %v1553_v34 = vadd.f32 %v2011_v31, %v3174_v10 }
 0x241   : > { %v1544_v46 = vpop.f32.mrf.mxu1 }
 0x242   : > { %v1625_v51 = vadd.f32 %v1609_v62, %v1553_v34  ;;  %v1545_v52 = vadd.f32 %v3174_v10, %v1544_v46 }
 0x243   : > { %v2012_v6 = vpop.f32.mrf.mxu1 }
 0x244   : > { %1641 = vst [vmem:[%s3183_s19 + $0x10] sm:$0xff] %v1625_v51  ;;  %v1623_v18 = vadd.f32 %v1607_v60, %v1545_v52  ;;  %v1556_v7 = vadd.f32 %v2012_v6, %v3174_v10 }
 0x245   : > { %v1547_v14 = vpop.f32.mrf.mxu1 }
 0x246   : > { %1639 = vst [vmem:[%s3183_s19] sm:$0xff] %v1623_v18  ;;  %v1626_v3 = vadd.f32 %v1610_v41, %v1556_v7  ;;  %v1548_v30 = vadd.f32 %v3174_v10, %v1547_v14 }
 0x248   : > { %1642 = vst [vmem:[%s3183_s19 + $0x18] sm:$0xff] %v1626_v3  ;;  %v1624_v13 = vadd.f32 %v1608_v58, %v1548_v30 }
 0x24a   : > { %1640 = vst [vmem:[%s3183_s19 + $0x8] sm:$0xff] %v1624_v13 }
 0x259   : > { %v2015_v37 = vpop.f32.mrf.mxu1 }
 0x25a   : > { %v1569_v16 = vadd.f32 %v2015_v37, %v3174_v10 }
 0x25b   : > { %v1560_v47 = vpop.f32.mrf.mxu1 }
 0x25c   : > { %v1629_v26 = vadd.f32 %v1613_v17, %v1569_v16  ;;  %v1561_v0 = vadd.f32 %v3174_v10, %v1560_v47 }
 0x25d   : > { %v2016_v48 = vpop.f32.mrf.mxu1 }
 0x25e   : > { %1645 = vst [vmem:[%s3183_s19 + $0x30] sm:$0xff] %v1629_v26  ;;  %v1627_v9 = vadd.f32 %v1611_v12, %v1561_v0  ;;  %v1572_v45 = vadd.f32 %v2016_v48, %v3174_v10 }
 0x25f   : > { %v1563_v19 = vpop.f32.mrf.mxu1 }
 0x260   : > { %1643 = vst [vmem:[%s3183_s19 + $0x20] sm:$0xff] %v1627_v9  ;;  %v1630_v4 = vadd.f32 %v1614_v39, %v1572_v45  ;;  %v1564_v43 = vadd.f32 %v3174_v10, %v1563_v19 }
 0x262   : > { %1646 = vst [vmem:[%s3183_s19 + $0x38] sm:$0xff] %v1630_v4  ;;  %v1628_v40 = vadd.f32 %v1612_v49, %v1564_v43 }
 0x264   : > { %1644 = vst [vmem:[%s3183_s19 + $0x28] sm:$0xff] %v1628_v40 }
 0x26c   : > { %v2019_v33 = vpop.f32.mrf.mxu1 }
 0x26d   : > { %v1585_v27 = vadd.f32 %v2019_v33, %v3174_v10 }
 0x26e   : > { %v1576_v57 = vpop.f32.mrf.mxu1 }
 0x26f   : > { %v1633_v28 = vadd.f32 %v1617_v59, %v1585_v27  ;;  %v1577_v63 = vadd.f32 %v3174_v10, %v1576_v57 }
 0x270   : > { %v2020_v23 = vpop.f32.mrf.mxu1 }
 0x271   : > { %1649 = vst [vmem:[%s3183_s19 + $0x50] sm:$0xff] %v1633_v28  ;;  %v1631_v42 = vadd.f32 %v1615_v5, %v1577_v63  ;;  %v1588_v11 = vadd.f32 %v2020_v23, %v3174_v10 }
 0x272   : > { %v1579_v54 = vpop.f32.mrf.mxu1 }
 0x273   : > { %1647 = vst [vmem:[%s3183_s19 + $0x40] sm:$0xff] %v1631_v42  ;;  %v1634_v44 = vadd.f32 %v1618_v20, %v1588_v11  ;;  %v1580_v21 = vadd.f32 %v3174_v10, %v1579_v54 }
 0x275   : > { %1650 = vst [vmem:[%s3183_s19 + $0x58] sm:$0xff] %v1634_v44  ;;  %v1632_v55 = vadd.f32 %v1616_v15, %v1580_v21 }
 0x277   : > { %1648 = vst [vmem:[%s3183_s19 + $0x48] sm:$0xff] %v1632_v55 }
 0x27f   : > { %v2023_v22 = vpop.f32.mrf.mxu1 }
 0x280   : > { %v1601_v53 = vadd.f32 %v2023_v22, %v3174_v10 }
 0x281   : > { %v1592_v56 = vpop.f32.mrf.mxu1 }
 0x282   : > { %v1637_v1 = vadd.f32 %v1621_v2, %v1601_v53  ;;  %v1593_v25 = vadd.f32 %v3174_v10, %v1592_v56 }
 0x283   : > { %v2024_v32 = vpop.f32.mrf.mxu1 }
 0x284   : > { %1653 = vst [vmem:[%s3183_s19 + $0x70] sm:$0xff] %v1637_v1  ;;  %v1635_v24 = vadd.f32 %v1619_v50, %v1593_v25  ;;  %v1604_v61 = vadd.f32 %v2024_v32, %v3174_v10 }
 0x285   : > { %v1595_v8 = vpop.f32.mrf.mxu1 }
 0x286   : > { %1651 = vst [vmem:[%s3183_s19 + $0x60] sm:$0xff] %v1635_v24  ;;  %v1638_v36 = vadd.f32 %v1622_v35, %v1604_v61  ;;  %v1596_v38 = vadd.f32 %v3174_v10, %v1595_v8 }
 0x288   : > { %1654 = vst [vmem:[%s3183_s19 + $0x78] sm:$0xff] %v1638_v36  ;;  %v1636_v31 = vadd.f32 %v1620_v29, %v1596_v38 }
 0x28a   : > { %1652 = vst [vmem:[%s3183_s19 + $0x68] sm:$0xff] %v1636_v31 }
 0x28b   : > { %2317 = shalt.err (!%p2314_p4)
}
 0x28c   : > { %s2318_s18 = scalar_lea.hbm %s3232_s20, 2048  ;;  %s2322_s27 = scalar_lea.hbm %s3347_s13, 8192 }
 0x28d   : > { %p2319_p6 = scmp.ne.s32.totalorder %s3232_s20, %s2318_s18  ;;  %p2323_p5 = scmp.lt.s32.totalorder %s3232_s20, %s3347_s13 }
 0x28e   : > { %p2324_p8 = scmp.lt.s32.totalorder %s2322_s27, %s2318_s18 }
 0x28f   : > { %p2320_p13 = pnand %p2319_p6, %p3348_p12 }
 0x290   : > { %p2325_p10 = por %p2324_p8, %p2323_p5 }
 0x291   : > { %p2321_p11 = pneg %p2320_p13 }
 0x293   : > { %p2326_p9 = pnand %p2325_p10, %p2321_p11 }
 0x295   : > { %2329 = shalt.err (!%p2326_p9)
}
 0x296   : > { %s2445_s12 = smov 128   ;;  %s2446_s1 = smov 8  }
 0x297   : > { %2039 = dma.vmem_to_hbm [thread:$0]  (%p3348_p12), %s3234_s5, 2048, %s3232_s20, %s3240_s23, %s2445_s12, %s2445_s12, %s2446_s1  }
 0x298 PF: > { %s3349_s7 = sld [smem:[#allocation16_spill]]  ;;  %p2066_p2 = scmp.ge.s32.totalorder %s2432_s11, 2 }
 0x299   : > { %s3350_s17 = sld [smem:[#allocation20_spill]] }
 0x29e   : > { %s1687_s16 = sand.u32 1, %s3349_s7  }
 0x29f   : > { %p3351_p1 = scmp.ne.s32.totalorder %s3350_s17, 0  ;;  %s1688_s15 = scalar_lea.sflag [#allocation5], %s1687_s16 }
 0x2a1   : > { %p2056_p3 = pnand %p2066_p2, %p3351_p1 }
 0x2a3   : > { %p2057_p7 = pneg %p2056_p3 }
 0x2a5   : > { %2387 = dma.done.wait (%p2057_p7), %s1688_s15, 2048  }
 0x2a6   : > { %2389 = vsyncadd (%p2057_p7), %s1688_s15, 4294965248  ;;  %s25_s11 = sadd.s32 1, %s2432_s11   ;;  %s3352_s30 = sld [smem:[#allocation18_spill]] }
 0x2a7   : > { %p22_p0 = scmp.ge.s32.totalorder %s25_s11, 6   ;;  %s3353_s9 = sld [smem:[#allocation21_spill]] }
 0x2a8   : > { %s3354_s5 = sld [smem:[#allocation22_spill]]  ;;  %s3355_s24 = smov %s2396_s25 }
 0x2a9   : > { %s3356_s25 = smov %s2400_s26  ;;  %s3357_s26 = smov %s2634_s3 }
 0x2aa   : > { %s3358_s27 = smov %s2408_s28  ;;  %s3359_s28 = smov %s2412_s29 }
 0x2ab   : > { %s3360_s29 = smov %s2629_s21  ;;  %s3361_s8 = smov %s2428_s10 }
 0x2ac   :  { %24 = sbr.rel (!%p22_p0) target bundleno = 16 (0x10), region = 113 }
 0x2ae   : > { %s3362_s10 = smov %s3354_s5 }
 0x2b1   :  { %1693 = vsyncpa [#allocation4], 1 }
 0x2b2   :  { %1695 = vsyncpa [#allocation4 + $0x1], 1 }
 0x2b3   :  { %1696 = vsyncpa [#allocation7], 1 }
 0x2b4   :  { %1697 = vsyncpa [#allocation10], 1 }
 0x2b5   :  { %1698 = vsyncpa [#allocation5], 1 }
 0x2b6   :  { %1700 = vsyncpa [#allocation5 + $0x1], 1 }

</bundles_post_ra>
